<compile_context>
chip_gen: v7x
topology: tpu7x:2x2x1
jax: 0.10.0
libtpu: 0.0.40
codegen_flags: <defaults>
</compile_context>

<pallas_src>
import jax
import jax.numpy as jnp
from jax import lax
from jax.experimental import pallas as pl
from jax.experimental.pallas import tpu as pltpu


def gat_gate_kernel(x_ref, adj_ref, w_ref, bw_ref, wa_ref, ba_ref,
                    gwx_ref, gwh_ref, gb_ref, out_ref):
    BB, N, Fin = x_ref.shape
    Fout = w_ref.shape[0]

    x = x_ref[...]                       # (BB, N, Fin)  f32
    adj = adj_ref[...]                   # (BB, N, N)    bf16 (0/1 mask)
    W = w_ref[...]                       # (Fout, Fin)   bf16
    bW = bw_ref[...]                     # (1, Fout)     f32
    WA = wa_ref[...]                     # (Fin, Fout)   bf16  == W.T @ A
    bA = ba_ref[...]                     # (1, Fout)     f32   == bW @ A
    gwx = gwx_ref[...]                   # (1, Fin)      f32   (gate weight on x)
    gwh = gwh_ref[...]                   # (1, Fout)     f32   (gate weight on h')
    gb = gb_ref[0, 0]                    # scalar        f32

    # ---- Dense layer once over the whole slab (two independent bf16 MXU passes) ----
    # (BB, N, Fin) -> (BB*N, Fin) is a free leading-dim collapse (N % 8 == 0).
    x_slab = x.reshape(BB * N, Fin).astype(jnp.bfloat16)
    h_slab = lax.dot_general(x_slab, W, (((1,), (1,)), ((), ())),
                             preferred_element_type=jnp.float32) + bW    # h = xW^T + b
    hA_slab = lax.dot_general(x_slab, WA, (((1,), (0,)), ((), ())),
                              preferred_element_type=jnp.float32) + bA   # hA = h @ A

    h = h_slab.reshape(BB, N, Fout)
    h_bf = h.astype(jnp.bfloat16)
    hA_bf = hA_slab.reshape(BB, N, Fout).astype(jnp.bfloat16)

    # ---- e = hA @ h^T, symmetrized with a second MXU product (no transpose) ----
    dn_qk = (((2,), (2,)), ((0,), (0,)))             # 'bqd,bkd->bqk'
    e1 = lax.dot_general(hA_bf, h_bf, dn_qk, preferred_element_type=jnp.float32)
    e2 = lax.dot_general(h_bf, hA_bf, dn_qk, preferred_element_type=jnp.float32)
    e = e1 + e2                                       # (BB, N, N)  == e + e.T

    # ---- masked softmax over torch dim=1 (axis=1 of the per-graph matrix) ----
    att = jnp.where(adj > 0, e, jnp.full_like(e, -9.0e15))
    att = att - jnp.max(att, axis=1, keepdims=True)
    att = jnp.exp(att)
    att = att * pl.reciprocal(jnp.sum(att, axis=1, keepdims=True), approx=True)
    att = att * adj.astype(jnp.float32)

    # ---- h_prime = relu(att @ h)  (batched bf16 MXU) ----
    dn_ij = (((2,), (1,)), ((0,), (0,)))             # 'bij,bjd->bid'
    h_prime = jnp.maximum(
        lax.dot_general(att.astype(jnp.bfloat16), h_bf, dn_ij,
                        preferred_element_type=jnp.float32), 0.0)        # (BB, N, Fout)

    # ---- gate([x, h_prime]) on the VPU: elementwise mul + lane reduction ----
    logit = jnp.sum(x * gwx + h_prime * gwh, axis=-1, keepdims=True) + gb  # (BB, N, 1)
    coeff = 1.0 / (1.0 + jnp.exp(-logit))                                  # sigmoid

    out_ref[...] = coeff * x + (1.0 - coeff) * h_prime


def _pick_block_batch(B, N, target_rows=256):
    """Pick the per-step batch BB (a divisor of B): smallest BB with BB*N >=
    target_rows (a full v6e/v7x MXU pass), while keeping >= 2 grid steps so
    both v7x TensorCores stay busy; otherwise the largest such divisor."""
    divs = [d for d in range(1, B + 1) if B % d == 0]
    cands = [d for d in divs if B // d >= 2] or divs
    good = [d for d in cands if d * N >= target_rows]
    return min(good) if good else max(cands)


def gat_gate(x, adj, W, bW, A, gate_w, gate_b, *, block_batch=None):
    """x: (B, N, Fin), adj: (B, N, N). Requires Fin == Fout (as in the torch usage)."""
    B, N, Fin = x.shape
    Fout = W.shape[0]
    assert Fin == Fout, "GAT_gate mixing requires n_in_feature == n_out_feature"

    BB = block_batch if block_batch is not None else _pick_block_batch(B, N)
    assert B % BB == 0, "batch must be divisible by the per-step block batch"

    # Parameter prep (outside the kernel, once): bf16 MXU operands, fold A into
    # the input projection, split the gate weight into its x / h_prime halves.
    Wf = W.astype(jnp.float32)
    Af = A.astype(jnp.float32)
    WA = (Wf.T @ Af)                               # (Fin, Fout): x @ WA == (xW^T) @ A
    bA = (bW.reshape(1, Fout).astype(jnp.float32) @ Af)       # (1, Fout)
    W_bf = W.astype(jnp.bfloat16)
    WA_bf = WA.astype(jnp.bfloat16)
    adj_bf = adj.astype(jnp.bfloat16)              # 0/1 mask: exact in bf16, half the bytes
    bW2 = bW.reshape(1, Fout).astype(jnp.float32)
    gwx = gate_w[:, :Fin].astype(jnp.float32)      # acts on x
    gwh = gate_w[:, Fin:].astype(jnp.float32)      # acts on h_prime
    gb2 = gate_b.reshape(1, 1).astype(jnp.float32)

    return pl.pallas_call(
        gat_gate_kernel,
        out_shape=jax.ShapeDtypeStruct((B, N, Fin), jnp.float32),
        grid_spec=pltpu.PrefetchScalarGridSpec(
            num_scalar_prefetch=0,
            grid=(B // BB,),
            in_specs=[
                pl.BlockSpec((BB, N, Fin), lambda b: (b, 0, 0)),
                pl.BlockSpec((BB, N, N), lambda b: (b, 0, 0)),
                pl.BlockSpec((Fout, Fin), lambda b: (0, 0)),
                pl.BlockSpec((1, Fout), lambda b: (0, 0)),
                pl.BlockSpec((Fin, Fout), lambda b: (0, 0)),
                pl.BlockSpec((1, Fout), lambda b: (0, 0)),
                pl.BlockSpec((1, Fin), lambda b: (0, 0)),
                pl.BlockSpec((1, Fout), lambda b: (0, 0)),
                pl.BlockSpec((1, 1), lambda b: (0, 0)),
            ],
            out_specs=pl.BlockSpec((BB, N, Fin), lambda b: (b, 0, 0)),
        ),
        compiler_params=pltpu.CompilerParams(
            dimension_semantics=("parallel",)),
    )(x.astype(jnp.float32), adj_bf, W_bf, bW2, WA_bf, bA, gwx, gwh, gb2)


def gat_gate_ref(x, adj, W, bW, A, gate_w, gate_b):
    """Pure-JAX f32 reference mirroring the PyTorch forward."""
    h = jnp.einsum("bnf,of->bno", x, W) + bW
    e = jnp.einsum("bjl,bkl->bjk", jnp.einsum("bnf,fo->bno", h, A), h)
    e = e + jnp.transpose(e, (0, 2, 1))
    att = jnp.where(adj > 0, e, jnp.full_like(e, -9.0e15))
    att = jax.nn.softmax(att, axis=1)
    att = att * adj
    h_prime = jax.nn.relu(jnp.einsum("bij,bjk->bik", att, h))
    cat = jnp.concatenate([x, h_prime], axis=-1)
    coeff = jax.nn.sigmoid(jnp.einsum("bnc,oc->bno", cat, gate_w) + gate_b)
    return coeff * x + (1.0 - coeff) * h_prime


if __name__ == "__main__":
    # Small shapes consistent with the module; B chosen so the per-step slab
    # reaches 128 rows (BB=8, N=16) while keeping an even 2-step grid.
    B, N, F = 16, 16, 32   # n_in_feature == n_out_feature == 32

    key = jax.random.PRNGKey(0)
    kx, kadj, kW, kb, kA, kgw, kgb = jax.random.split(key, 7)

    x = jax.random.normal(kx, (B, N, F), dtype=jnp.float32)
    # symmetric 0/1 adjacency with self-loops
    r = jax.random.uniform(kadj, (B, N, N))
    adj = (r + jnp.transpose(r, (0, 2, 1)) > 1.0).astype(jnp.float32)
    adj = jnp.maximum(adj, jnp.eye(N, dtype=jnp.float32)[None])

    # deterministic synthetic parameters (PyTorch inits A to zeros; we use small
    # random values so the attention path is exercised)
    W = 0.1 * jax.random.normal(kW, (F, F), dtype=jnp.float32)            # Linear(F,F).weight
    bW = 0.1 * jax.random.normal(kb, (F,), dtype=jnp.float32)             # Linear(F,F).bias
    A = 0.1 * jax.random.normal(kA, (F, F), dtype=jnp.float32)            # Parameter(F,F)
    gate_w = 0.1 * jax.random.normal(kgw, (1, 2 * F), dtype=jnp.float32)  # Linear(2F,1).weight
    gate_b = 0.1 * jax.random.normal(kgb, (1,), dtype=jnp.float32)        # Linear(2F,1).bias

    out = jax.block_until_ready(gat_gate(x, adj, W, bW, A, gate_w, gate_b))
    ref = gat_gate_ref(x, adj, W, bW, A, gate_w, gate_b)

    assert out.shape == (B, N, F)
    # bf16 MXU operands + approx reciprocal introduce ~1e-2-level absolute
    # deviations at these magnitudes, hence the loosened tolerance.
    err = jnp.max(jnp.abs(out - ref))
    assert jnp.allclose(out, ref, atol=5e-2, rtol=5e-2), f"max abs err {err}"

    print("KERNEL_OK")
</pallas_src>

<mosaic_0001>
module attributes {stable_mosaic.version = 11 : i64} {
  func.func @gat_gate_kernel(%arg0: i32, %arg1: memref<8x16x32xf32, #tpu.memory_space<vmem>>, %arg2: memref<8x16x16xbf16, #tpu.memory_space<vmem>>, %arg3: memref<32x32xbf16, #tpu.memory_space<vmem>>, %arg4: memref<1x32xf32, #tpu.memory_space<vmem>>, %arg5: memref<32x32xbf16, #tpu.memory_space<vmem>>, %arg6: memref<1x32xf32, #tpu.memory_space<vmem>>, %arg7: memref<1x32xf32, #tpu.memory_space<vmem>>, %arg8: memref<1x32xf32, #tpu.memory_space<vmem>>, %arg9: memref<1x1xf32, #tpu.memory_space<vmem>>, %arg10: memref<8x16x32xf32, #tpu.memory_space<vmem>>) attributes {dimension_semantics = [#tpu.dimension_semantics<parallel>], iteration_bounds = array<i64: 2>, scalar_prefetch = 0 : i64, scratch_operands = 0 : i64, tpu.core_type = #tpu.core_type<tc>, window_params = [{transform_indices = @transform_0, window_bounds = array<i64: 8, 16, 32>}, {transform_indices = @transform_1, window_bounds = array<i64: 8, 16, 16>}, {pipeline_mode = #tpu.pipeline_mode<synchronous>, transform_indices = @transform_2, window_bounds = array<i64: 32, 32>}, {pipeline_mode = #tpu.pipeline_mode<synchronous>, transform_indices = @transform_3, window_bounds = array<i64: 1, 32>}, {pipeline_mode = #tpu.pipeline_mode<synchronous>, transform_indices = @transform_4, window_bounds = array<i64: 32, 32>}, {pipeline_mode = #tpu.pipeline_mode<synchronous>, transform_indices = @transform_5, window_bounds = array<i64: 1, 32>}, {pipeline_mode = #tpu.pipeline_mode<synchronous>, transform_indices = @transform_6, window_bounds = array<i64: 1, 32>}, {pipeline_mode = #tpu.pipeline_mode<synchronous>, transform_indices = @transform_7, window_bounds = array<i64: 1, 32>}, {pipeline_mode = #tpu.pipeline_mode<synchronous>, transform_indices = @transform_8, window_bounds = array<i64: 1, 1>}, {transform_indices = @transform_9, window_bounds = array<i64: 8, 16, 32>}]} {
    %c0 = arith.constant 0 : index
    %c0_0 = arith.constant 0 : index
    %c0_1 = arith.constant 0 : index
    %0 = vector.load %arg1[%c0, %c0_0, %c0_1] : memref<8x16x32xf32, #tpu.memory_space<vmem>>, vector<8x16x32xf32>
    %c0_2 = arith.constant 0 : index
    %c0_3 = arith.constant 0 : index
    %c0_4 = arith.constant 0 : index
    %1 = vector.load %arg2[%c0_2, %c0_3, %c0_4] : memref<8x16x16xbf16, #tpu.memory_space<vmem>>, vector<8x16x16xbf16>
    %c0_5 = arith.constant 0 : index
    %c0_6 = arith.constant 0 : index
    %2 = vector.load %arg3[%c0_5, %c0_6] : memref<32x32xbf16, #tpu.memory_space<vmem>>, vector<32x32xbf16>
    %c0_7 = arith.constant 0 : index
    %c0_8 = arith.constant 0 : index
    %3 = vector.load %arg4[%c0_7, %c0_8] : memref<1x32xf32, #tpu.memory_space<vmem>>, vector<1x32xf32>
    %c0_9 = arith.constant 0 : index
    %c0_10 = arith.constant 0 : index
    %4 = vector.load %arg5[%c0_9, %c0_10] : memref<32x32xbf16, #tpu.memory_space<vmem>>, vector<32x32xbf16>
    %c0_11 = arith.constant 0 : index
    %c0_12 = arith.constant 0 : index
    %5 = vector.load %arg6[%c0_11, %c0_12] : memref<1x32xf32, #tpu.memory_space<vmem>>, vector<1x32xf32>
    %c0_13 = arith.constant 0 : index
    %c0_14 = arith.constant 0 : index
    %6 = vector.load %arg7[%c0_13, %c0_14] : memref<1x32xf32, #tpu.memory_space<vmem>>, vector<1x32xf32>
    %c0_15 = arith.constant 0 : index
    %c0_16 = arith.constant 0 : index
    %7 = vector.load %arg8[%c0_15, %c0_16] : memref<1x32xf32, #tpu.memory_space<vmem>>, vector<1x32xf32>
    %c0_17 = arith.constant 0 : index
    %c0_18 = arith.constant 0 : index
    %8 = vector.load %arg9[%c0_17, %c0_18] : memref<1x1xf32, #tpu.memory_space<vmem>>, vector<1x1xf32>
    %9 = vector.extract %8[0, 0] : f32 from vector<1x1xf32>
    %10 = vector.shape_cast %0 : vector<8x16x32xf32> to vector<128x32xf32>
    %11 = arith.truncf %10 : vector<128x32xf32> to vector<128x32xbf16>
    %cst = arith.constant dense<0.000000e+00> : vector<128x32xf32>
    %12 = tpu.matmul %11, %2, %cst {dimension_numbers = #tpu.dot_dimension_numbers<[1], [1], [0], [0], [0, 0, 1, 0], [], []>} : vector<128x32xbf16>, vector<32x32xbf16>, vector<128x32xf32> -> vector<128x32xf32>
    %13 = vector.broadcast %3 : vector<1x32xf32> to vector<128x32xf32>
    %14 = arith.addf %12, %13 : vector<128x32xf32>
    %cst_19 = arith.constant dense<0.000000e+00> : vector<128x32xf32>
    %15 = tpu.matmul %11, %4, %cst_19 {dimension_numbers = #tpu.dot_dimension_numbers<[1], [0], [0], [1], [0, 0, 1, 1], [], []>} : vector<128x32xbf16>, vector<32x32xbf16>, vector<128x32xf32> -> vector<128x32xf32>
    %16 = vector.broadcast %5 : vector<1x32xf32> to vector<128x32xf32>
    %17 = arith.addf %15, %16 : vector<128x32xf32>
    %18 = vector.shape_cast %14 : vector<128x32xf32> to vector<8x16x32xf32>
    %19 = arith.truncf %18 : vector<8x16x32xf32> to vector<8x16x32xbf16>
    %20 = vector.shape_cast %17 : vector<128x32xf32> to vector<8x16x32xf32>
    %21 = arith.truncf %20 : vector<8x16x32xf32> to vector<8x16x32xbf16>
    %cst_20 = arith.constant dense<0.000000e+00> : vector<8x16x16xf32>
    %22 = tpu.matmul %21, %19, %cst_20 {dimension_numbers = #tpu.dot_dimension_numbers<[2], [2], [1], [1], [0, 0, 0, 1, 1, 1], [0], [0]>} : vector<8x16x32xbf16>, vector<8x16x32xbf16>, vector<8x16x16xf32> -> vector<8x16x16xf32>
    %cst_21 = arith.constant dense<0.000000e+00> : vector<8x16x16xf32>
    %23 = tpu.matmul %19, %21, %cst_21 {dimension_numbers = #tpu.dot_dimension_numbers<[2], [2], [1], [1], [0, 0, 0, 1, 1, 1], [0], [0]>} : vector<8x16x32xbf16>, vector<8x16x32xbf16>, vector<8x16x16xf32> -> vector<8x16x16xf32>
    %24 = arith.addf %22, %23 : vector<8x16x16xf32>
    %cst_22 = arith.constant 0.000000e+00 : bf16
    %25 = vector.broadcast %cst_22 : bf16 to vector<8x16x16xbf16>
    %26 = arith.cmpf ogt, %1, %25 : vector<8x16x16xbf16>
    %cst_23 = arith.constant -9.000000e+15 : f32
    %27 = vector.broadcast %cst_23 : f32 to vector<8x16x16xf32>
    %28 = arith.select %26, %24, %27 : vector<8x16x16xi1>, vector<8x16x16xf32>
    %cst_24 = arith.constant dense<0xFF800000> : vector<8x16xf32>
    %29 = vector.multi_reduction <maximumf>, %28, %cst_24 [1] : vector<8x16x16xf32> to vector<8x16xf32>
    %30 = vector.shape_cast %29 : vector<8x16xf32> to vector<8x1x16xf32>
    %31 = vector.broadcast %30 : vector<8x1x16xf32> to vector<8x16x16xf32>
    %32 = arith.subf %28, %31 : vector<8x16x16xf32>
    %33 = math.exp %32 : vector<8x16x16xf32>
    %cst_25 = arith.constant dense<0.000000e+00> : vector<8x16xf32>
    %34 = vector.multi_reduction <add>, %33, %cst_25 [1] : vector<8x16x16xf32> to vector<8x16xf32>
    %35 = vector.shape_cast %34 : vector<8x16xf32> to vector<8x1x16xf32>
    %36 = tpu.reciprocal %35 {approx = true} : vector<8x1x16xf32> -> vector<8x1x16xf32>
    %37 = vector.broadcast %36 : vector<8x1x16xf32> to vector<8x16x16xf32>
    %38 = arith.mulf %33, %37 : vector<8x16x16xf32>
    %39 = arith.extf %1 : vector<8x16x16xbf16> to vector<8x16x16xf32>
    %40 = arith.mulf %38, %39 : vector<8x16x16xf32>
    %41 = arith.truncf %40 : vector<8x16x16xf32> to vector<8x16x16xbf16>
    %cst_26 = arith.constant dense<0.000000e+00> : vector<8x16x32xf32>
    %42 = tpu.matmul %41, %19, %cst_26 {dimension_numbers = #tpu.dot_dimension_numbers<[2], [1], [1], [2], [0, 0, 0, 1, 1, 2], [0], [0]>} : vector<8x16x16xbf16>, vector<8x16x32xbf16>, vector<8x16x32xf32> -> vector<8x16x32xf32>
    %cst_27 = arith.constant 0.000000e+00 : f32
    %43 = vector.broadcast %cst_27 : f32 to vector<8x16x32xf32>
    %44 = arith.maximumf %42, %43 : vector<8x16x32xf32>
    %45 = vector.shape_cast %6 : vector<1x32xf32> to vector<1x1x32xf32>
    %46 = vector.broadcast %45 : vector<1x1x32xf32> to vector<8x16x32xf32>
    %47 = arith.mulf %0, %46 : vector<8x16x32xf32>
    %48 = vector.shape_cast %7 : vector<1x32xf32> to vector<1x1x32xf32>
    %49 = vector.broadcast %48 : vector<1x1x32xf32> to vector<8x16x32xf32>
    %50 = arith.mulf %44, %49 : vector<8x16x32xf32>
    %51 = arith.addf %47, %50 : vector<8x16x32xf32>
    %cst_28 = arith.constant dense<0.000000e+00> : vector<8x16xf32>
    %52 = vector.multi_reduction <add>, %51, %cst_28 [2] : vector<8x16x32xf32> to vector<8x16xf32>
    %53 = vector.shape_cast %52 : vector<8x16xf32> to vector<8x16x1xf32>
    %54 = vector.broadcast %9 : f32 to vector<8x16x1xf32>
    %55 = arith.addf %53, %54 : vector<8x16x1xf32>
    %cst_29 = arith.constant 0.000000e+00 : f32
    %56 = vector.broadcast %cst_29 : f32 to vector<8x16x1xf32>
    %57 = arith.subf %56, %55 : vector<8x16x1xf32>
    %58 = math.exp %57 : vector<8x16x1xf32>
    %cst_30 = arith.constant 1.000000e+00 : f32
    %59 = vector.broadcast %cst_30 : f32 to vector<8x16x1xf32>
    %60 = arith.addf %59, %58 : vector<8x16x1xf32>
    %cst_31 = arith.constant 1.000000e+00 : f32
    %61 = vector.broadcast %cst_31 : f32 to vector<8x16x1xf32>
    %62 = arith.divf %61, %60 : vector<8x16x1xf32>
    %63 = vector.broadcast %62 : vector<8x16x1xf32> to vector<8x16x32xf32>
    %64 = arith.mulf %63, %0 : vector<8x16x32xf32>
    %cst_32 = arith.constant 1.000000e+00 : f32
    %65 = vector.broadcast %cst_32 : f32 to vector<8x16x1xf32>
    %66 = arith.subf %65, %62 : vector<8x16x1xf32>
    %67 = vector.broadcast %66 : vector<8x16x1xf32> to vector<8x16x32xf32>
    %68 = arith.mulf %67, %44 : vector<8x16x32xf32>
    %69 = arith.addf %64, %68 : vector<8x16x32xf32>
    %c0_33 = arith.constant 0 : index
    %c0_34 = arith.constant 0 : index
    %c0_35 = arith.constant 0 : index
    %70 = vector.load %arg10[%c0_33, %c0_34, %c0_35] : memref<8x16x32xf32, #tpu.memory_space<vmem>>, vector<8x16x32xf32>
    tpu.vector_store %arg10[%c0_33, %c0_34, %c0_35], %69 {strides = array<i32>} : memref<8x16x32xf32, #tpu.memory_space<vmem>>, vector<8x16x32xf32>,
    return
  }
  func.func @transform_0(%arg0: i32) -> (i32, i32, i32) {
    %c0_i32 = arith.constant 0 : i32
    %c0_i32_0 = arith.constant 0 : i32
    %c0_i32_1 = arith.constant 0 : i32
    return %arg0, %c0_i32, %c0_i32_0 : i32, i32, i32
  }
  func.func @transform_1(%arg0: i32) -> (i32, i32, i32) {
    %c0_i32 = arith.constant 0 : i32
    %c0_i32_0 = arith.constant 0 : i32
    %c0_i32_1 = arith.constant 0 : i32
    return %arg0, %c0_i32, %c0_i32_0 : i32, i32, i32
  }
  func.func @transform_2(%arg0: i32) -> (i32, i32) {
    %c0_i32 = arith.constant 0 : i32
    %c0_i32_0 = arith.constant 0 : i32
    %c0_i32_1 = arith.constant 0 : i32
    return %c0_i32, %c0_i32_0 : i32, i32
  }
  func.func @transform_3(%arg0: i32) -> (i32, i32) {
    %c0_i32 = arith.constant 0 : i32
    %c0_i32_0 = arith.constant 0 : i32
    %c0_i32_1 = arith.constant 0 : i32
    return %c0_i32, %c0_i32_0 : i32, i32
  }
  func.func @transform_4(%arg0: i32) -> (i32, i32) {
    %c0_i32 = arith.constant 0 : i32
    %c0_i32_0 = arith.constant 0 : i32
    %c0_i32_1 = arith.constant 0 : i32
    return %c0_i32, %c0_i32_0 : i32, i32
  }
  func.func @transform_5(%arg0: i32) -> (i32, i32) {
    %c0_i32 = arith.constant 0 : i32
    %c0_i32_0 = arith.constant 0 : i32
    %c0_i32_1 = arith.constant 0 : i32
    return %c0_i32, %c0_i32_0 : i32, i32
  }
  func.func @transform_6(%arg0: i32) -> (i32, i32) {
    %c0_i32 = arith.constant 0 : i32
    %c0_i32_0 = arith.constant 0 : i32
    %c0_i32_1 = arith.constant 0 : i32
    return %c0_i32, %c0_i32_0 : i32, i32
  }
  func.func @transform_7(%arg0: i32) -> (i32, i32) {
    %c0_i32 = arith.constant 0 : i32
    %c0_i32_0 = arith.constant 0 : i32
    %c0_i32_1 = arith.constant 0 : i32
    return %c0_i32, %c0_i32_0 : i32, i32
  }
  func.func @transform_8(%arg0: i32) -> (i32, i32) {
    %c0_i32 = arith.constant 0 : i32
    %c0_i32_0 = arith.constant 0 : i32
    %c0_i32_1 = arith.constant 0 : i32
    return %c0_i32, %c0_i32_0 : i32, i32
  }
  func.func @transform_9(%arg0: i32) -> (i32, i32, i32) {
    %c0_i32 = arith.constant 0 : i32
    %c0_i32_0 = arith.constant 0 : i32
    %c0_i32_1 = arith.constant 0 : i32
    return %arg0, %c0_i32, %c0_i32_0 : i32, i32, i32
  }
}

</mosaic_0001>

<bundles_post_ra>
// kernel: tpu_custom_call.1
= control target key start
LH: loop header
LB: loop body
LE: loop exit
PB: predicated region body
PF: predicated region fallthrough
CT: control target
= control target key end

     0   :  { %s4560_s0 = inlined_call_operand.hbm [shape: f32[16,16,32], index: 0, kind: input, shape index: {}]   ;;  %s4561_s1 = inlined_call_operand.hbm [shape: bf16[16,16,16], index: 1, kind: input, shape index: {}]   ;;  %s4562_s2 = inlined_call_operand.hbm [shape: bf16[32,32], index: 2, kind: input, shape index: {}]   ;;  %s4563_s3 = inlined_call_operand.vmem [shape: f32[1,32], index: 3, kind: input, shape index: {}]   ;;  %s4564_s4 = inlined_call_operand.vmem [shape: bf16[32,32], index: 4, kind: input, shape index: {}]   ;;  %s4565_s5 = inlined_call_operand.vmem [shape: f32[1,32], index: 5, kind: input, shape index: {}]   ;;  %s4566_s6 = inlined_call_operand.vmem [shape: f32[1,32], index: 6, kind: input, shape index: {}]   ;;  %s4567_s7 = inlined_call_operand.vmem [shape: f32[1,32], index: 7, kind: input, shape index: {}]   ;;  %s4568_s8 = inlined_call_operand.<no memory space> [shape: f32[1,1], index: 8, kind: input, shape index: {}]   ;;  %s4569_s9 = inlined_call_operand.hbm [shape: f32[16,16,32], index: 9, kind: output, shape index: {}]  }
   0x1   :  { %4583 = sst [smem:[#allocation18_spill]] %s4560_s0  ;;  %v14_v0 = vstv %s4568_s8 }
   0x2   :  { %4584 = sst [smem:[#allocation19_spill]] %s4562_s2  ;;  %15 = vst [vmem:[#allocation2] sm:$0x1] %v14_v0 }
   0x3   :  { %16 = vsyncpa [#allocation4], 0 }
   0x4   :  { %18 = vsyncpa [#allocation4 + $0x1], 0 }
   0x5   :  { %19 = vsyncpa [#allocation7], 0 }
   0x6   :  { %21 = vsyncpa [#allocation7 + $0x1], 0 }
   0x7   :  { %22 = vsyncpa [#allocation5], 0 }
   0x8   :  { %24 = vsyncpa [#allocation5 + $0x1], 0  ;;  %s3372_s11 = smov 0   ;;  %s3374_s12 = smov 0  }
   0x9   :  { %s3376_s13 = smov 0   ;;  %s3378_s14 = smov 0  }
   0xa LB: > { %4585 = sst [smem:[#allocation14_spill]] %s3300_s13  ;;  %s3393_s8 = sadd.s32 4294967295, %s3304_s14   ;;  %s3304_s14 = sphi %s3378_s14, %s4644_s14   ;;  %s3300_s13 = sphi %s3376_s13, %s4646_s13   ;;  %s3296_s12 = sphi %s3374_s12, %s4648_s12   ;;  %s3292_s11 = sphi %s3372_s11, %s4647_s11  }
   0xb   : > { %s2574_s15 = sadd.s32 4294967294, %s3304_s14   ;;  %p50_p0 = scmp.ne.s32.totalorder %s3296_s12, %s3292_s11 }
   0xc   : > { %p4570_p1 = scmp.eq.s32.totalorder %s3393_s8, 0  ;;  %p253_p3 = scmp.eq.s32.totalorder %s2574_s15, 1 }
   0xd   : > { %p2575_p5 = scmp.ge.s32.totalorder %s3304_s14, 1  ;;  %p260_p7 = scmp.lt.s32.totalorder %s3304_s14, 3 }
   0xe   : > { %p3402_p4 = por %p4570_p1, %p50_p0  ;;  %p3407_p6 = por %p253_p3, %p50_p0 }
   0xf   : > { %p3412_p8 = pnand %p2575_p5, %p260_p7  ;;  %s3306_s19 = smov [#allocation8]  }
  0x10   : > { %s4586_s16 = scalar_select %p3402_p4, 1, 0 }
  0x11   : > { %s4587_s17 = scalar_select %p3407_p6, 1, 0 }
  0x12   : > { %s4589_s18 = scalar_select %p3412_p8, 1, 0 }
  0x13   : > { %4588 = sst [smem:[#allocation15_spill]] %s4587_s17  ;;  %s272_s20 = sshll.u32 %s3306_s19, 4  ;;  %s3416_s20 = int_to_ptr.vmem [resolvable:$true] %s272_s20 }
  0x14   : > { %p2949_p9 = pneg %p3412_p8  ;;  %s3428_s22 = sadd.s32 1, %s3304_s14  }
  0x15   : > { %4591 = sst [smem:[#allocation16_spill]] %s3428_s22  ;;  %s37_s23 = sadd.s32 1, %s3300_s13 }
  0x16   : > { %p3423_p11 = pnand %p2949_p9, %p4570_p1  ;;  %s34_s24 = ssub.s32 %s3304_s14, %s3428_s22 }
  0x17   : > { %s4592_s2 = sld [smem:[#allocation19_spill]] }
  0x18   : > { %p3144_p13 = pneg %p3423_p11 }
  0x1d   : > { %s3142_s27 = scalar_lea.hbm %s4592_s2, 256 }
  0x1e   : > { %p3143_p12 = scmp.ne.s32.totalorder %s4592_s2, %s3142_s27  ;;  %p3149_p5 = scmp.lt.u32.totalorder %s3142_s27, %s4592_s2 }
  0x20   : > { %p3145_p0 = pnand %p3144_p13, %p3143_p12 }
  0x22   : > { %p3146_p3 = pneg %p3145_p0 }
  0x24   : > { %p3151_p7 = pnand %p3149_p5, %p3146_p3 }
  0x26   : > { %3154 = shalt.err (!%p3151_p7)
}
  0x27   : > { %s3155_s15 = scalar_lea.vmem %s3416_s20, 256  ;;  %p3163_p2 = scmp.lt.s32.totalorder %s3416_s20, %s3416_s20 }
  0x28   : > { %p3156_p9 = scmp.ne.s32.totalorder %s3416_s20, %s3155_s15  ;;  %p3164_p6 = scmp.lt.s32.totalorder %s3155_s15, %s3155_s15 }
  0x2a   : > { %p3158_p10 = pnand %p3156_p9, %p3144_p13  ;;  %p3165_p4 = por %p3164_p6, %p3163_p2 }
  0x2c   : > { %p3159_p1 = pneg %p3158_p10 }
  0x2e   : > { %p3166_p8 = pnand %p3165_p4, %p3159_p1 }
  0x30   : > { %3169 = shalt.err (!%p3166_p8)
}
  0x31   : > { %s4573_s19 = smov 64   ;;  %s4574_s25 = smov 4  }
  0x32   : > { %2952 = dma.hbm_to_vmem [thread:$0]  (!%p3423_p11), %s4592_s2, 256, %s3416_s20, [#allocation7], %s4573_s19, %s4573_s19, %s4574_s25  }
  0x33   : > { %p35_p1 = scmp.eq.s32.totalorder %s34_s24, 0  ;;  %p44_p2 = scmp.ne.s32.totalorder %s3300_s13, %s3296_s12 }
  0x34   : > { %p45_p4 = scmp.eq.s32.totalorder %s3304_s14, 0  ;;  %p2965_p6 = scmp.lt.s32.totalorder %s3304_s14, 2 }
  0x35   : > { %s3462_s28 = scalar_select %p35_p1, %s3300_s13, %s37_s23  }
  0x36   : > { %p46_p8 = por %p45_p4, %p44_p2  ;;  %p4594_p10 = scmp.eq.s32.totalorder %s3393_s8, 1 }
  0x37   : > { %4593 = sst [smem:[#allocation17_spill]] %s3462_s28  ;;  %s3471_s21 = sand.u32 1, %s3300_s13  }
  0x38   : > { %p3466_p12 = por %p4594_p10, %p44_p2  ;;  %s2646_s30 = sshll.u32 %s3304_s14, 11 }
  0x39   : > { %s2578_s10 = sshll.u32 %s3471_s21, 7  ;;  %s4596_s0 = sld [smem:[#allocation18_spill]] }
  0x3a   : > { %s308_s23 = scalar_lea.vmem [#allocation3], %s2578_s10  ;;  %p3480_p11 = pnand %p2965_p6, %p46_p8 }
  0x3b   : > { %s316_s26 = sshll.u32 %s308_s23, 4  ;;  %s3484_s26 = int_to_ptr.vmem [resolvable:$true] %s316_s26 }
  0x3c   : > { %p3172_p0 = pneg %p3480_p11 }
  0x3f   : > { %s3478_s24 = scalar_lea.hbm %s4596_s0, %s2646_s30  ;;  %s3175_s15 = scalar_lea.hbm %s4596_s0, 4096 }
  0x40   : > { %s3170_s25 = scalar_lea.hbm %s3478_s24, 2048  ;;  %p3176_p7 = scmp.lt.u32.totalorder %s3478_s24, %s4596_s0 }
  0x41   : > { %p3171_p13 = scmp.ne.s32.totalorder %s3478_s24, %s3170_s25  ;;  %p3177_p9 = scmp.lt.u32.totalorder %s3175_s15, %s3170_s25 }
  0x42   : > { %p3179_p2 = scmp.lt.u32.totalorder %s3170_s25, %s3478_s24 }
  0x43   : > { %p3173_p3 = pnand %p3172_p0, %p3171_p13  ;;  %p3178_p1 = por %p3177_p9, %p3176_p7 }
  0x45   : > { %p3174_p5 = pneg %p3173_p3  ;;  %p3180_p4 = por %p3179_p2, %p3178_p1 }
  0x47   : > { %p3181_p6 = pnand %p3180_p4, %p3174_p5 }
  0x49   : > { %3184 = shalt.err (!%p3181_p6)
}
  0x4a   : > { %s3185_s19 = scalar_lea.vmem %s3484_s26, 2048  ;;  %s3309_s30 = smov [#allocation3]  }
  0x4b   : > { %p3186_p8 = scmp.ne.s32.totalorder %s3484_s26, %s3185_s19  ;;  %s3190_s10 = sshll.u32 %s3309_s30, 4  ;;  %s3191_s10 = int_to_ptr.vmem [resolvable:$false] %s3190_s10 }
  0x4c   : > { %s3192_s20 = scalar_lea.vmem %s3191_s10, 4096  ;;  %p3193_p3 = scmp.lt.s32.totalorder %s3484_s26, %s3191_s10 }
  0x4d   : > { %p3188_p10 = pnand %p3186_p8, %p3172_p0  ;;  %p3194_p7 = scmp.lt.s32.totalorder %s3192_s20, %s3185_s19 }
  0x4f   : > { %p3189_p13 = pneg %p3188_p10  ;;  %p3195_p9 = por %p3194_p7, %p3193_p3 }
  0x51   : > { %p3196_p1 = pnand %p3195_p9, %p3189_p13 }
  0x53   : > { %3199 = shalt.err (!%p3196_p1)
}
  0x54   : > { %s3310_s25 = smov 128   ;;  %s3311_s15 = smov 8  }
  0x55   : > { %s4598_s23 = scalar_lea.sflag [#allocation4], %s3471_s21  ;;  %s326_s30 = sand.u32 1, %s3304_s14  }
  0x56   : > { %2956 = dma.hbm_to_vmem [thread:$0]  (!%p3480_p11), %s3478_s24, 2048, %s3484_s26, %s4598_s23, %s3310_s25, %s3310_s25, %s3311_s15  }
  0x57   : > { %s2582_s0 = sshll.u32 %s3471_s21, 6  ;;  %s2648_s10 = sshll.u32 %s3304_s14, 10 }
  0x58   : > { %s330_s19 = scalar_lea.vmem [#allocation6], %s2582_s0  ;;  %s3520_s13 = scalar_lea.hbm %s4561_s1, %s2648_s10 }
  0x59   : > { %s338_s20 = sshll.u32 %s330_s19, 4  ;;  %s3524_s22 = scalar_lea.sflag [#allocation7], %s326_s30  ;;  %s3522_s20 = int_to_ptr.vmem [resolvable:$true] %s338_s20 }
  0x5a   : > { %s3200_s17 = scalar_lea.hbm %s3520_s13, 1024  ;;  %s3205_s2 = scalar_lea.hbm %s4561_s1, 2048 }
  0x5b   : > { %p3201_p5 = scmp.ne.s32.totalorder %s3520_s13, %s3200_s17  ;;  %p3206_p6 = scmp.lt.u32.totalorder %s3520_s13, %s4561_s1 }
  0x5c   : > { %p3207_p8 = scmp.lt.u32.totalorder %s3205_s2, %s3200_s17  ;;  %p3209_p13 = scmp.lt.u32.totalorder %s3200_s17, %s3520_s13 }
  0x5d   : > { %p3203_p2 = pnand %p3201_p5, %p3172_p0 }
  0x5e   : > { %p3208_p10 = por %p3207_p8, %p3206_p6 }
  0x5f   : > { %p3204_p4 = pneg %p3203_p2 }
  0x60   : > { %p3210_p3 = por %p3209_p13, %p3208_p10 }
  0x62   : > { %p3211_p7 = pnand %p3210_p3, %p3204_p4 }
  0x64   : > { %3214 = shalt.err (!%p3211_p7)
}
  0x65   : > { %s3215_s26 = scalar_lea.vmem %s3522_s20, 1024  ;;  %s3312_s25 = smov [#allocation6]  }
  0x66   : > { %p3216_p9 = scmp.ne.s32.totalorder %s3522_s20, %s3215_s26  ;;  %s3220_s15 = sshll.u32 %s3312_s25, 4  ;;  %s3221_s15 = int_to_ptr.vmem [resolvable:$false] %s3220_s15 }
  0x67   : > { %s3222_s23 = scalar_lea.vmem %s3221_s15, 2048  ;;  %p3223_p2 = scmp.lt.s32.totalorder %s3522_s20, %s3221_s15 }
  0x68   : > { %p3218_p1 = pnand %p3216_p9, %p3172_p0  ;;  %p3224_p6 = scmp.lt.s32.totalorder %s3222_s23, %s3215_s26 }
  0x6a   : > { %p3219_p5 = pneg %p3218_p1  ;;  %p3225_p8 = por %p3224_p6, %p3223_p2 }
  0x6c   : > { %p3226_p10 = pnand %p3225_p8, %p3219_p5 }
  0x6e   : > { %3229 = shalt.err (!%p3226_p10)
}
  0x6f   : > { %s4599_s17 = smov 4   ;;  %s4600_s30 = smov 64  }
  0x70   : > { %2959 = dma.hbm_to_vmem [thread:$0]  (!%p3480_p11), %s3520_s13, 1024, %s3522_s20, %s3524_s22, %s4600_s30, %s4600_s30, %s4599_s17  }
  0x71   : > { %p4601_p0 = scmp.ne.s32.totalorder %s4589_s18, 0 }
  0x72   : > { %s3556_s10 = sand.u32 (!%p4601_p0), 1, %s3296_s12   ;;  %p4602_p4 = scmp.ne.s32.totalorder (!%p4601_p0), %s4586_s16, 0 }
  0x73   : > { %350 = sbr.rel (%p4601_p0) target bundleno = 1127 (0x467), region = 56  ;;  %s2587_s19 = sshll.u32 (!%p4601_p0), %s3556_s10, 7 }
  0x74   : > { %s353_s0 = scalar_lea.sflag (!%p4601_p0), [#allocation4], %s3556_s10  ;;  %s3562_s27 = scalar_lea.vmem (!%p4601_p0), [#allocation3], %s2587_s19 }
  0x7a   : > { %3275 = dma.done.wait (%p4602_p4), %s353_s0, 2048  }
  0x7b   : > { %3277 = vsyncadd (%p4602_p4), %s353_s0, 4294965248  ;;  %s361_s13 = sand.u32 1, %s3393_s8   ;;  %s2588_s18 = sshll.u32 %s3556_s10, 6 }
  0x7c   : > { %s362_s22 = scalar_lea.sflag [#allocation7], %s361_s13  ;;  %s3570_s20 = scalar_lea.vmem [#allocation6], %s2588_s18 }
  0x7d   : > { %3279 = dma.done.wait (%p4602_p4), %s362_s22, 1024  }
  0x7e   : > { %3281 = vsyncadd (%p4602_p4), %s362_s22, 4294966272  ;;  %p4603_p11 = scmp.eq.s32.totalorder %s3393_s8, 0 }
  0x80   : > { %3283 = dma.done.wait (%p4603_p11), [#allocation7], 256   ;;  %p4604_p13 = pmov %p4603_p11 }
  0x81   : > { %vm485_vm0 = vcmask 261120   ;;  %v3010_v1 = vld [vmem:[#allocation8] sm:$0xff]   ;;  %v416_v6 = vld [vmem:[%s3562_s27 + $0x8] sm:$0xff]  ;;  %v417_v9 = vld [vmem:[%s3562_s27 + $0x10] sm:$0xff]  ;;  %v3313_v31 = vmov 0.0   ;;  %vm3314_vm1 = vmmov 0  }
  0x82   : > { %3285 = vsyncadd (%p4604_p13), [#allocation7], 4294967040  ;;  %v3011_v2 = vld [vmem:[%s4564_s4] sm:$0xff]   ;;  %2935 = vmatprep.subr.msk.bf16.mxu0 %vm485_vm0, %v3010_v1  ;;  %v511_v3 = vsel %vm485_vm0, %v3010_v1, 0  ;;  %v3012_v4 = vld [vmem:[%s4564_s4 + $0x8] sm:$0xff]   ;;  %vm1528_vm13 = vcmask 130048  }
  0x83   : > { %2739 = vmatprep.subr.bf16.mxu1 %v3011_v2  ;;  %2720 = vmatpush3.bf16.xpose.msra.mxu0 %v511_v3  ;;  %v415_v5 = vld [vmem:[%s3562_s27] sm:$0xff]  ;;  %v3013_v8 = vld [vmem:[#allocation8 + $0x8] sm:$0xff]   ;;  %v418_v10 = vld [vmem:[%s3562_s27 + $0x18] sm:$0xff]  ;;  %s4432_s13 = scalar_lea.vmem [#allocation9], %s2587_s19  ;;  %s2650_s19 = sshll.u32 %s3393_s8, 11 }
  0x84   : > { %2740 = vmatpush3.bf16.msra.mxu1 %v3011_v2  ;;  %v461_v7 = vpack.c.bf16 %v416_v6, %v415_v5  ;;  %v419_v11 = vld [vmem:[%s3562_s27 + $0x20] sm:$0xff]  ;;  %v420_v12 = vld [vmem:[%s3562_s27 + $0x28] sm:$0xff]  ;;  %2936 = vmatprep.subr.msk.bf16.mxu0 %vm485_vm0, %v3013_v8  ;;  %v462_v13 = vpack.c.bf16 %v418_v10, %v417_v9  ;;  %v514_v14 = vsel %vm485_vm0, %v3013_v8, 0  ;;  %v421_v16 = vld [vmem:[%s3562_s27 + $0x30] sm:$0xff]  ;;  %s2469_s18 = sshll.u32 %s4432_s13, 4  ;;  %s4510_s21 = scalar_lea.hbm %s4569_s9, %s2650_s19  ;;  %s4512_s18 = int_to_ptr.vmem [resolvable:$true] %s2469_s18 }
  0x85   : > { %2741 = vmatprep.subr.bf16.mxu1 %v3012_v4  ;;  %v463_v15 = vpack.c.bf16 %v420_v12, %v419_v11  ;;  %v422_v17 = vld [vmem:[%s3562_s27 + $0x38] sm:$0xff]  ;;  %v423_v18 = vld [vmem:[%s3562_s27 + $0x40] sm:$0xff]  ;;  %v424_v19 = vld [vmem:[%s3562_s27 + $0x48] sm:$0xff]  ;;  %s2455_s8 = scalar_lea.sflag [#allocation5], %s3556_s10  ;;  %s3230_s2 = scalar_lea.vmem %s4512_s18, 2048 }
  0x86   : > { %2743 = vmatprep.mubr.msk.bf16.mxu1 %vm485_vm0, %v461_v7  ;;  %2723 = vmatprep.mubr.msk.bf16.mxu0 %vm485_vm0, %v461_v7  ;;  %v464_v20 = vpack.c.bf16 %v422_v17, %v421_v16  ;;  %v465_v21 = vpack.c.bf16 %v424_v19, %v423_v18  ;;  %v425_v22 = vld [vmem:[%s3562_s27 + $0x50] sm:$0xff]  ;;  %v426_v23 = vld [vmem:[%s3562_s27 + $0x58] sm:$0xff]  ;;  %v427_v24 = vld [vmem:[%s3562_s27 + $0x60] sm:$0xff]  ;;  %p3231_p3 = scmp.ne.s32.totalorder %s4512_s18, %s3230_s2  ;;  %s3316_s16 = smov [#allocation9]  }
  0x87   : > { %v428_v25 = vld [vmem:[%s3562_s27 + $0x68] sm:$0xff]  ;;  %v466_v26 = vpack.c.bf16 %v426_v23, %v425_v22  ;;  %v429_v28 = vld [vmem:[%s3562_s27 + $0x70] sm:$0xff]  ;;  %v430_v29 = vld [vmem:[%s3562_s27 + $0x78] sm:$0xff]  ;;  %s3234_s28 = sshll.u32 %s3316_s16, 4  ;;  %s3235_s28 = int_to_ptr.vmem [resolvable:$false] %s3234_s28 }
  0x88   : > { %2742 = vmatpush3.bf16.msra.mxu1 %v3012_v4  ;;  %v467_v27 = vpack.c.bf16 %v428_v25, %v427_v24  ;;  %v468_v30 = vpack.c.bf16 %v430_v29, %v429_v28  ;;  %v3631_v33 = vld [vmem:[%s4565_s5] ss:$0 sm:$0xff]  ;;  %p3232_p7 = pnand %p3231_p3, %p3466_p12  ;;  %s3236_s24 = scalar_lea.vmem %s3235_s28, 4096 }
  0x89   : > { %2759 = vmatprep.subr.bf16.mxu1 %v3313_v31  ;;  %v3644_v44 = vld [vmem:[%s4563_s3] ss:$0 sm:$0xff]  ;;  %p3237_p1 = scmp.lt.s32.totalorder %s4512_s18, %s3235_s28  ;;  %p3238_p5 = scmp.lt.s32.totalorder %s3236_s24, %s3230_s2 }
  0x8a   : > { %p3233_p9 = pneg %p3232_p7 }
  0x8b   : > { %2744 = vmatmul.mubr.msk.bf16.vlgmr.msra.gmra.mrb[0].mxu1 %vm485_vm0, %v462_v13  ;;  %2722 = vmatpush3.bf16.xpose.msra.mxu0 %v514_v14  ;;  %p3239_p2 = por %p3238_p5, %p3237_p1 }
  0x8c   : > { %2747 = vmatprep.mubr.msk.bf16.mxu1 %vm485_vm0, %v463_v15  ;;  %2765 = vmatprep.subr.bf16.mxu0 %v3313_v31 }
  0x8d   : > { %p3240_p6 = pnand %p3239_p2, %p3233_p9 }
  0x92   : > { %2724 = vmatmul.mubr.msk.bf16.vlgmr.msra.gmra.mrb[0].mxu0 %vm485_vm0, %v462_v13 }
  0x93   : > { %2748 = vmatmul.mubr.msk.bf16.gmra.mrb[4].mxu1 %vm485_vm0, %v464_v20  ;;  %2727 = vmatprep.mubr.msk.bf16.mxu0 %vm485_vm0, %v463_v15 }
  0x94   : > { %2751 = vmatprep.mubr.msk.bf16.mxu1 %vm485_vm0, %v465_v21 }
  0x9a   : > { %2728 = vmatmul.mubr.msk.bf16.gmra.mrb[4].mxu0 %vm485_vm0, %v464_v20 }
  0x9b   : > { %2752 = vmatmul.mubr.msk.bf16.gmra.mrb[8].mxu1 %vm485_vm0, %v466_v26  ;;  %2731 = vmatprep.mubr.msk.bf16.mxu0 %vm485_vm0, %v465_v21 }
  0x9c   : > { %2755 = vmatprep.mubr.msk.bf16.mxu1 %vm485_vm0, %v467_v27 }
  0xa2   : > { %2732 = vmatmul.mubr.msk.bf16.gmra.mrb[8].mxu0 %vm485_vm0, %v466_v26 }
  0xa3   : > { %2756 = vmatmul.mubr.msk.bf16.gmra.mrb[12].mxu1 %vm485_vm0, %v468_v30  ;;  %2735 = vmatprep.mubr.msk.bf16.mxu0 %vm485_vm0, %v467_v27 }
  0xa4   : > { %2761 = vmatprep.mubr.msk.bf16.mxu1 %vm3314_vm1, %v3313_v31 }
  0xaa   : > { %2736 = vmatmul.mubr.msk.bf16.gmra.mrb[12].mxu0 %vm485_vm0, %v468_v30 }
  0xab   : > { %2767 = vmatprep.mubr.msk.bf16.mxu0 %vm3314_vm1, %v3313_v31 }
 0x15e   : > { %v2745_v32 = vpop.f32.mrb[0].mxu1 }
 0x15f   : > { %v665_v34 = vpop.f32.mrb[1].mxu1  ;;  %v674_v36 = vadd.f32 %v2745_v32, %v3631_v33 }
 0x160   : > { %v2746_v35 = vpop.f32.mrb[2].mxu1  ;;  %v666_v39 = vadd.f32 %v3631_v33, %v665_v34 }
 0x161   : > { %v677_v37 = vadd.f32 %v2746_v35, %v3631_v33  ;;  %v668_v38 = vpop.f32.mrb[3].mxu1 }
 0x162   : > { %v669_v40 = vadd.f32 %v3631_v33, %v668_v38 }
 0x163   : > { %v3637_v41 = vpack.c.bf16 %v677_v37, %v674_v36 }
 0x164   : > { %v3639_v42 = vpack.c.bf16 %v669_v40, %v666_v39 }
 0x165   : > { %v2725_v43 = vpop.f32.mrb[0].mxu0  ;;  %v795_v45 = vsel %vm485_vm0, %v3637_v41, 0 }
 0x166   : > { %v2749_v46 = vpop.f32.mrb[4].mxu1  ;;  %2766 = vmatpush3.bf16.xpose.msra.mxu0 %v795_v45  ;;  %v550_v47 = vpop.f32.mrb[1].mxu0  ;;  %v748_v48 = vsel %vm485_vm0, %v3639_v42, 0  ;;  %v559_v51 = vadd.f32 %v2725_v43, %v3644_v44 }
 0x167   : > { %v681_v49 = vpop.f32.mrb[5].mxu1  ;;  %2760 = vmatpush3.bf16.xpose.msra.mxu1 %v748_v48  ;;  %v2726_v50 = vpop.f32.mrb[2].mxu0  ;;  %2777 = vmatprep.subr.bf16.mxu0 %v3313_v31  ;;  %v690_v55 = vadd.f32 %v2749_v46, %v3631_v33  ;;  %v551_v56 = vadd.f32 %v3644_v44, %v550_v47 }
 0x168   : > { %v562_v52 = vadd.f32 %v2726_v50, %v3644_v44  ;;  %v2750_v53 = vpop.f32.mrb[6].mxu1  ;;  %v553_v54 = vpop.f32.mrb[3].mxu0  ;;  %2771 = vmatprep.subr.bf16.mxu1 %v3313_v31  ;;  %v682_v60 = vadd.f32 %v3631_v33, %v681_v49 }
 0x169   : > { %v693_v57 = vadd.f32 %v2750_v53, %v3631_v33  ;;  %v554_v58 = vadd.f32 %v3644_v44, %v553_v54  ;;  %v684_v59 = vpop.f32.mrb[7].mxu1 }
 0x16a   : > { %v3659_v61 = vpack.c.bf16 %v562_v52, %v559_v51  ;;  %v685_v62 = vadd.f32 %v3631_v33, %v684_v59 }
 0x16b   : > { %v3662_v63 = vpack.c.bf16 %v693_v57, %v690_v55  ;;  %v3664_v0 = vpack.c.bf16 %v554_v58, %v551_v56 }
 0x16c   : > { %v3666_v1 = vpack.c.bf16 %v685_v62, %v682_v60 }
 0x16d   : > { %2768 = vmatmul.mubr.msk.bf16.vlgmr.msra.gmra.mrb[16].mxu0 %vm485_vm0, %v3659_v61  ;;  %v2729_v2 = vpop.f32.mrb[4].mxu0  ;;  %v889_v3 = vsel %vm485_vm0, %v3662_v63, 0 }
 0x16e   : > { %v2753_v4 = vpop.f32.mrb[8].mxu1  ;;  %2762 = vmatmul.mubr.msk.bf16.vlgmr.msra.gmra.mrb[16].mxu1 %vm485_vm0, %v3664_v0  ;;  %2778 = vmatpush3.bf16.xpose.msra.mxu0 %v889_v3  ;;  %v566_v5 = vpop.f32.mrb[5].mxu0  ;;  %v842_v6 = vsel %vm485_vm0, %v3666_v1, 0  ;;  %v575_v9 = vadd.f32 %v2729_v2, %v3644_v44  ;;  %v792_v2 = vsel %vm485_vm0, %v3659_v61, 0  ;;  %v745_v3 = vsel %vm485_vm0, %v3664_v0, 0 }
 0x16f   : > { %v697_v7 = vpop.f32.mrb[9].mxu1  ;;  %2772 = vmatpush3.bf16.xpose.msra.mxu1 %v842_v6  ;;  %v2730_v8 = vpop.f32.mrb[6].mxu0  ;;  %2779 = vmatprep.mubr.msk.bf16.mxu0 %vm3314_vm1, %v3313_v31  ;;  %v706_v13 = vadd.f32 %v2753_v4, %v3631_v33  ;;  %v567_v14 = vadd.f32 %v3644_v44, %v566_v5  ;;  %v3815_v5 = vld [vmem:[%s3570_s20 + $0x8] sm:$0xf]  ;;  %v3818_v6 = vld [vmem:[%s3570_s20] sm:$0xf] }
 0x170   : > { %v578_v10 = vadd.f32 %v2730_v8, %v3644_v44  ;;  %v2754_v11 = vpop.f32.mrb[10].mxu1  ;;  %v569_v12 = vpop.f32.mrb[7].mxu0  ;;  %2773 = vmatprep.mubr.msk.bf16.mxu1 %vm3314_vm1, %v3313_v31  ;;  %2789 = vmatprep.subr.bf16.mxu0 %v3313_v31  ;;  %v698_v18 = vadd.f32 %v3631_v33, %v697_v7  ;;  %v3821_v7 = vld [vmem:[%s3570_s20 + $0xc] sm:$0xf]  ;;  %v3824_v8 = vld [vmem:[%s3570_s20 + $0x4] sm:$0xf] }
 0x171   : > { %v709_v15 = vadd.f32 %v2754_v11, %v3631_v33  ;;  %v570_v16 = vadd.f32 %v3644_v44, %v569_v12  ;;  %v700_v17 = vpop.f32.mrb[11].mxu1  ;;  %2783 = vmatprep.subr.bf16.mxu1 %v3313_v31  ;;  %vm1450_vm2 = vcmp.gt.bf16.partialorder %v3815_v5, 0  ;;  %vm1448_vm3 = vcmp.gt.bf16.partialorder %v3818_v6, 0 }
 0x172   : > { %v3689_v19 = vpack.c.bf16 %v578_v10, %v575_v9  ;;  %v701_v20 = vadd.f32 %v3631_v33, %v700_v17  ;;  %vm1451_vm4 = vcmp.gt.bf16.partialorder %v3821_v7, 0  ;;  %vm1449_vm5 = vcmp.gt.bf16.partialorder %v3824_v8, 0  ;;  %v3845_v17 = vld [vmem:[%s3570_s20 + $0x1c] sm:$0xf] }
 0x173   : > { %v3692_v21 = vpack.c.bf16 %v709_v15, %v706_v13  ;;  %v3694_v22 = vpack.c.bf16 %v570_v16, %v567_v14  ;;  %v3315_v9 = vmov 0   ;;  %vm1455_vm9 = vcmp.gt.bf16.partialorder %v3845_v17, 0 }
 0x174   : > { %v3696_v23 = vpack.c.bf16 %v701_v20, %v698_v18  ;;  %v1466_v10 = vsel %vm1450_vm2, 65537, %v3315_v9  ;;  %v1464_v11 = vsel %vm1448_vm3, 65537, %v3315_v9  ;;  %v1467_v12 = vsel %vm1451_vm4, 65537, %v3315_v9  ;;  %v3848_v18 = vld [vmem:[%s3570_s20 + $0x14] sm:$0xf] }
 0x175   : > { %2780 = vmatmul.mubr.msk.bf16.vlgmr.msra.gmra.mrb[20].mxu0 %vm485_vm0, %v3689_v19  ;;  %v2733_v24 = vpop.f32.mrb[8].mxu0  ;;  %v983_v25 = vsel %vm485_vm0, %v3692_v21, 0  ;;  %v839_v4 = vsel %vm485_vm0, %v3694_v22, 0  ;;  %v1465_v13 = vsel %vm1449_vm5, 65537, %v3315_v9  ;;  %v1482_v14 = vunpack.c.l.b16 %v1466_v10 }
 0x176   : > { %v2757_v26 = vpop.f32.mrb[12].mxu1  ;;  %2774 = vmatmul.mubr.msk.bf16.vlgmr.msra.gmra.mrb[20].mxu1 %vm485_vm0, %v3694_v22  ;;  %2790 = vmatpush3.bf16.xpose.msra.mxu0 %v983_v25  ;;  %v582_v27 = vpop.f32.mrb[9].mxu0  ;;  %v936_v28 = vsel %vm485_vm0, %v3696_v23, 0  ;;  %v591_v32 = vadd.f32 %v2733_v24, %v3644_v44  ;;  %v1480_v20 = vunpack.c.l.b16 %v1464_v11  ;;  %v3851_v24 = vld [vmem:[%s3570_s20 + $0x28] sm:$0xf]  ;;  %vm1453_vm10 = vcmp.gt.bf16.partialorder %v3848_v18, 0 }
 0x177   : > { %v713_v29 = vpop.f32.mrb[13].mxu1  ;;  %2784 = vmatpush3.bf16.xpose.msra.mxu1 %v936_v28  ;;  %v2734_v30 = vpop.f32.mrb[10].mxu0  ;;  %2791 = vmatprep.mubr.msk.bf16.mxu0 %vm3314_vm1, %v3313_v31  ;;  %v722_v37 = vadd.f32 %v2757_v26, %v3631_v33  ;;  %v583_v38 = vadd.f32 %v3644_v44, %v582_v27  ;;  %v3854_v25 = vld [vmem:[%s3570_s20 + $0x20] sm:$0xf]  ;;  %vm3856_vm8 = vcmp.ne.s32.totalorder %v1482_v14, 0  ;;  %vm1458_vm11 = vcmp.gt.bf16.partialorder %v3851_v24, 0 }
 0x178   : > { %v594_v34 = vadd.f32 %v2734_v30, %v3644_v44  ;;  %v2758_v35 = vpop.f32.mrb[14].mxu1  ;;  %v585_v36 = vpop.f32.mrb[11].mxu0  ;;  %2785 = vmatprep.mubr.msk.bf16.mxu1 %vm3314_vm1, %v3313_v31  ;;  %2801 = vmatprep.subr.bf16.mxu0 %v3313_v31  ;;  %v714_v45 = vadd.f32 %v3631_v33, %v713_v29  ;;  %vm1456_vm12 = vcmp.gt.bf16.partialorder %v3854_v25, 0  ;;  %v3865_v29 = vld [vmem:[%s3570_s20 + $0x2c] sm:$0xf]  ;;  %vm3870_vm14 = vcmp.ne.s32.totalorder %v1480_v20, 0 }
 0x179   : > { %v725_v39 = vadd.f32 %v2758_v35, %v3631_v33  ;;  %v586_v40 = vadd.f32 %v3644_v44, %v585_v36  ;;  %v716_v43 = vpop.f32.mrb[15].mxu1  ;;  %2795 = vmatprep.subr.bf16.mxu1 %v3313_v31  ;;  %v3868_v30 = vld [vmem:[%s3570_s20 + $0x24] sm:$0xf]  ;;  %vm1459_vm5 = vcmp.gt.bf16.partialorder %v3865_v29, 0 }
 0x17a   : > { %v3719_v46 = vpack.c.bf16 %v594_v34, %v591_v32  ;;  %v717_v47 = vadd.f32 %v3631_v33, %v716_v43  ;;  %v1474_v43 = vsel %vm1458_vm11, 65537, %v3315_v9  ;;  %v3956_v32 = vld [vmem:[%s3570_s20 + $0x34] sm:$0xf] }
 0x17b   : > { %v3722_v48 = vpack.c.bf16 %v725_v39, %v722_v37  ;;  %v3724_v49 = vpack.c.bf16 %v586_v40, %v583_v38  ;;  %v1471_v38 = vsel %vm1455_vm9, 65537, %v3315_v9  ;;  %v1469_v39 = vsel %vm1453_vm10, 65537, %v3315_v9 }
 0x17c   : > { %v742_v50 = vpack.c.bf16 %v717_v47, %v714_v45  ;;  %v3894_v45 = vsel %vm1456_vm12, 65537, %v3315_v9 }
 0x17d   : > { %2792 = vmatmul.mubr.msk.bf16.vlgmr.msra.gmra.mrb[24].mxu0 %vm485_vm0, %v3719_v46  ;;  %v2737_v51 = vpop.f32.mrb[12].mxu0  ;;  %v1077_v52 = vsel %vm485_vm0, %v3722_v48, 0 }
 0x17e   : > { %2786 = vmatmul.mubr.msk.bf16.vlgmr.msra.gmra.mrb[24].mxu1 %vm485_vm0, %v3724_v49  ;;  %2802 = vmatpush3.bf16.xpose.msra.mxu0 %v1077_v52  ;;  %v598_v53 = vpop.f32.mrb[13].mxu0  ;;  %v1030_v54 = vsel %vm485_vm0, %v742_v50, 0  ;;  %v607_v55 = vadd.f32 %v2737_v51, %v3644_v44  ;;  %v3903_v51 = vld [vmem:[%s3570_s20 + $0x38] sm:$0xf] }
 0x17f   : > { %2796 = vmatpush3.bf16.xpose.msra.mxu1 %v1030_v54  ;;  %v2738_v33 = vpop.f32.mrb[14].mxu0  ;;  %2803 = vmatprep.mubr.msk.bf16.mxu0 %vm3314_vm1, %v3313_v31  ;;  %v599_v58 = vadd.f32 %v3644_v44, %v598_v53 }
 0x180   : > { %v610_v56 = vadd.f32 %v2738_v33, %v3644_v44  ;;  %v601_v57 = vpop.f32.mrb[15].mxu0  ;;  %2797 = vmatprep.mubr.msk.bf16.mxu1 %vm3314_vm1, %v3313_v31  ;;  %2813 = vmatprep.subr.bf16.mxu0 %v3313_v31  ;;  %v1487_v33 = vunpack.c.l.b16 %v1471_v38 }
 0x181   : > { %v602_v59 = vadd.f32 %v3644_v44, %v601_v57  ;;  %2807 = vmatprep.subr.bf16.mxu1 %v3313_v31  ;;  %v886_v44 = vsel %vm485_vm0, %v3689_v19, 0 }
 0x182   : > { %v3743_v60 = vpack.c.bf16 %v610_v56, %v607_v55  ;;  %v3910_v55 = vld [vmem:[%s3570_s20 + $0x30] sm:$0xf]  ;;  %vm3933_vm9 = vcmp.ne.s32.totalorder %v1487_v33, 0 }
 0x183   : > { %v3745_v62 = vpack.c.bf16 %v602_v59, %v599_v58  ;;  %v1485_v59 = vunpack.c.l.b16 %v1469_v39 }
 0x185   : > { %2804 = vmatmul.mubr.msk.bf16.vlgmr.msra.gmra.mrb[28].mxu0 %vm485_vm0, %v3743_v60  ;;  %vm3943_vm10 = vcmp.ne.s32.totalorder %v1485_v59, 0 }
 0x186   : > { %2798 = vmatmul.mubr.msk.bf16.vlgmr.msra.gmra.mrb[28].mxu1 %vm485_vm0, %v3745_v62  ;;  %2814 = vmatpush3.bf16.xpose.msra.mxu0 %v792_v2  ;;  %v1490_v2 = vunpack.c.l.b16 %v1474_v43 }
 0x187   : > { %2808 = vmatpush3.bf16.xpose.msra.mxu1 %v745_v3  ;;  %2815 = vmatprep.mubr.msk.bf16.mxu0 %vm3314_vm1, %v3313_v31  ;;  %v3917_v3 = vld [vmem:[%s3570_s20 + $0x3c] sm:$0xf] }
 0x188   : > { %2809 = vmatprep.mubr.msk.bf16.mxu1 %vm3314_vm1, %v3313_v31  ;;  %2825 = vmatprep.subr.bf16.mxu0 %v3313_v31  ;;  %vm1463_vm11 = vcmp.gt.bf16.partialorder %v3917_v3, 0  ;;  %vm3949_vm12 = vcmp.ne.s32.totalorder %v1490_v2, 0 }
 0x189   : > { %2819 = vmatprep.subr.bf16.mxu1 %v3313_v31  ;;  %v1479_v33 = vsel %vm1463_vm11, 65537, %v3315_v9 }
 0x18d   : > { %2816 = vmatmul.mubr.msk.bf16.vlgmr.msra.gmra.mrb[16].mxu0 %vm485_vm0, %v3637_v41  ;;  %v980_v41 = vsel %vm485_vm0, %v3719_v46, 0 }
 0x18e   : > { %2810 = vmatmul.mubr.msk.bf16.vlgmr.msra.gmra.mrb[16].mxu1 %vm485_vm0, %v3639_v42  ;;  %2826 = vmatpush3.bf16.xpose.msra.mxu0 %v886_v44  ;;  %v933_v42 = vsel %vm485_vm0, %v3724_v49, 0 }
 0x18f   : > { %2820 = vmatpush3.bf16.xpose.msra.mxu1 %v839_v4  ;;  %2827 = vmatprep.mubr.msk.bf16.mxu0 %vm3314_vm1, %v3313_v31 }
 0x190   : > { %2821 = vmatprep.mubr.msk.bf16.mxu1 %vm3314_vm1, %v3313_v31  ;;  %2837 = vmatprep.subr.bf16.mxu0 %v3313_v31 }
 0x191   : > { %2831 = vmatprep.subr.bf16.mxu1 %v3313_v31 }
 0x195   : > { %2828 = vmatmul.mubr.msk.bf16.vlgmr.msra.gmra.mrb[20].mxu0 %vm485_vm0, %v3662_v63  ;;  %v1074_v63 = vsel %vm485_vm0, %v3743_v60, 0 }
 0x196   : > { %2822 = vmatmul.mubr.msk.bf16.vlgmr.msra.gmra.mrb[20].mxu1 %vm485_vm0, %v3666_v1  ;;  %2838 = vmatpush3.bf16.xpose.msra.mxu0 %v980_v41  ;;  %v1027_v1 = vsel %vm485_vm0, %v3745_v62, 0 }
 0x197   : > { %2832 = vmatpush3.bf16.xpose.msra.mxu1 %v933_v42  ;;  %2839 = vmatprep.mubr.msk.bf16.mxu0 %vm3314_vm1, %v3313_v31 }
 0x198   : > { %2833 = vmatprep.mubr.msk.bf16.mxu1 %vm3314_vm1, %v3313_v31  ;;  %2849 = vmatprep.subr.bf16.mxu0 %v3313_v31 }
 0x199   : > { %2843 = vmatprep.subr.bf16.mxu1 %v3313_v31 }
 0x19d   : > { %2840 = vmatmul.mubr.msk.bf16.vlgmr.msra.gmra.mrb[24].mxu0 %vm485_vm0, %v3692_v21  ;;  %v1483_v21 = vunpack.c.l.b16 %v1467_v12 }
 0x19e   : > { %2834 = vmatmul.mubr.msk.bf16.vlgmr.msra.gmra.mrb[24].mxu1 %vm485_vm0, %v3696_v23  ;;  %2850 = vmatpush3.bf16.xpose.msra.mxu0 %v1074_v63  ;;  %v1481_v23 = vunpack.c.l.b16 %v1465_v13  ;;  %v1475_v13 = vsel %vm1459_vm5, 65537, %v3315_v9 }
 0x19f   : > { %2844 = vmatpush3.bf16.xpose.msra.mxu1 %v1027_v1  ;;  %2851 = vmatprep.mubr.msk.bf16.mxu0 %vm3314_vm1, %v3313_v31  ;;  %vm3874_vm15 = vcmp.ne.s32.totalorder %v1483_v21, 0 }
 0x1a0   : > { %2845 = vmatprep.mubr.msk.bf16.mxu1 %vm3314_vm1, %v3313_v31  ;;  %2861 = vmatprep.subr.bf16.mxu0 %v3313_v31  ;;  %vm3878_vm2 = vcmp.ne.s32.totalorder %v1481_v23, 0 }
 0x1a1   : > { %2855 = vmatprep.subr.bf16.mxu1 %v3313_v31 }
 0x1a5   : > { %2852 = vmatmul.mubr.msk.bf16.vlgmr.msra.gmra.mrb[28].mxu0 %vm485_vm0, %v3722_v48 }
 0x1a6   : > { %2846 = vmatmul.mubr.msk.bf16.vlgmr.msra.gmra.mrb[28].mxu1 %vm485_vm0, %v742_v50  ;;  %2862 = vmatpush3.bf16.msra.mxu0 %v3659_v61  ;;  %v3828_v61 = vld [vmem:[%s3570_s20 + $0x18] sm:$0xf] }
 0x1a7   : > { %2856 = vmatpush3.bf16.msra.mxu1 %v3664_v0  ;;  %2863 = vmatprep.mubr.msk.bf16.mxu0 %vm3314_vm1, %v3313_v31  ;;  %v3831_v0 = vld [vmem:[%s3570_s20 + $0x10] sm:$0xf]  ;;  %vm1454_vm6 = vcmp.gt.bf16.partialorder %v3828_v61, 0 }
 0x1a8   : > { %2873 = vmatprep.subr.bf16.mxu0 %v3313_v31  ;;  %2857 = vmatprep.mubr.msk.bf16.mxu1 %vm3314_vm1, %v3313_v31  ;;  %vm1452_vm7 = vcmp.gt.bf16.partialorder %v3831_v0, 0  ;;  %v1470_v15 = vsel %vm1454_vm6, 65537, %v3315_v9  ;;  %vm1457_vm6 = vcmp.gt.bf16.partialorder %v3868_v30, 0 }
 0x1a9   : > { %2867 = vmatprep.subr.bf16.mxu1 %v3313_v31  ;;  %v1468_v16 = vsel %vm1452_vm7, 65537, %v3315_v9  ;;  %v1486_v26 = vunpack.c.l.b16 %v1470_v15  ;;  %vm1462_vm7 = vcmp.gt.bf16.partialorder %v3903_v51, 0  ;;  %v1473_v14 = vsel %vm1457_vm6, 65537, %v3315_v9 }
 0x1aa   : > { %v1484_v27 = vunpack.c.l.b16 %v1468_v16  ;;  %v1478_v20 = vsel %vm1462_vm7, 65537, %v3315_v9  ;;  %v1489_v43 = vunpack.c.l.b16 %v1473_v14 }
 0x1ab   : > { %vm3882_vm3 = vcmp.ne.s32.totalorder %v1486_v26, 0 }
 0x1ac   : > { %vm3886_vm4 = vcmp.ne.s32.totalorder %v1484_v27, 0  ;;  %v1488_v27 = vunpack.c.l.b16 %v3894_v45 }
 0x260   : > { %v1195_v40 = vpop.f32.mrb[16].mxu0 }
 0x261   : > { %v3900_v47 = vsel %vm3856_vm8, %v1195_v40, -9e+15  ;;  %v1154_v48 = vpop.f32.mrb[16].mxu1  ;;  %v2817_v50 = vpop.f32.mrb[17].mxu0  ;;  %vm1460_vm8 = vcmp.gt.bf16.partialorder %v3910_v55, 0  ;;  %v1491_v40 = vunpack.c.l.b16 %v1475_v13 }
 0x262   : > { %v3907_v52 = vsel %vm3870_vm14, %v1154_v48, -9e+15  ;;  %v2811_v53 = vpop.f32.mrb[17].mxu1  ;;  %v1198_v54 = vpop.f32.mrb[18].mxu0  ;;  %v1538_v44 = vsel %vm1528_vm13, %v3900_v47, -inf  ;;  %v1476_v28 = vsel %vm1460_vm8, 65537, %v3315_v9 }
 0x263   : > { %v3914_v56 = vsel %vm3874_vm15, %v1198_v54, -9e+15  ;;  %v1157_v57 = vpop.f32.mrb[18].mxu1  ;;  %v2818_v58 = vpop.f32.mrb[19].mxu0  ;;  %v1529_v63 = vsel %vm1528_vm13, %v3907_v52, -inf  ;;  %v1494_v54 = vunpack.c.l.b16 %v1478_v20  ;;  %v1492_v2 = vunpack.c.l.b16 %v1476_v28 }
 0x264   : > { %v1539_v4 = vsel %vm1528_vm13, %v3914_v56, -inf  ;;  %v3925_v41 = vsel %vm3878_vm2, %v1157_v57, -9e+15  ;;  %v2812_v42 = vpop.f32.mrb[19].mxu1  ;;  %vm1461_vm14 = vcmp.gt.bf16.partialorder %v3956_v32, 0  ;;  %vm3987_vm15 = vcmp.ne.s32.totalorder %v1488_v27, 0 }
 0x265   : > { %v1540_v1 = vmax.f32 %v1538_v44, %v1539_v4  ;;  %v1530_v10 = vsel %vm1528_vm13, %v3925_v41, -inf  ;;  %v1477_v20 = vsel %vm1461_vm14, 65537, %v3315_v9  ;;  %vm3991_vm2 = vcmp.ne.s32.totalorder %v1491_v40, 0 }
 0x266   : > { %v1531_v11 = vmax.f32 %v1529_v63, %v1530_v10  ;;  %vm4007_vm5 = vcmp.ne.s32.totalorder %v1492_v2, 0 }
 0x267   : > { %v1541_v15 = vrot.slane %v1540_v1, 4 }
 0x268   : > { %v1532_v21 = vrot.slane %v1531_v11, 4  ;;  %v1277_v23 = vpop.f32.mrb[20].mxu0 }
 0x269   : > { %v1542_v34 = vmax.f32 %v1540_v1, %v1541_v15  ;;  %v3960_v35 = vsel %vm3882_vm3, %v1277_v23, -9e+15  ;;  %v1236_v38 = vpop.f32.mrb[20].mxu1  ;;  %v2829_v39 = vpop.f32.mrb[21].mxu0  ;;  %v1495_v15 = vunpack.c.l.b16 %v1479_v33  ;;  %vm3995_vm3 = vcmp.ne.s32.totalorder %v1489_v43, 0 }
 0x26a   : > { %v1533_v48 = vmax.f32 %v1531_v11, %v1532_v21  ;;  %v3964_v50 = vsel %vm3886_vm4, %v1236_v38, -9e+15  ;;  %v2823_v53 = vpop.f32.mrb[21].mxu1  ;;  %v1280_v45 = vpop.f32.mrb[22].mxu0  ;;  %v1556_v44 = vsel %vm1528_vm13, %v3960_v35, -inf  ;;  %vm3999_vm4 = vcmp.ne.s32.totalorder %v1494_v54, 0 }
 0x26b   : > { %v1543_v57 = vrot.slane %v1542_v34, 2  ;;  %v3971_v36 = vsel %vm3933_vm9, %v1280_v45, -9e+15  ;;  %v1239_v58 = vpop.f32.mrb[22].mxu1  ;;  %v2830_v59 = vpop.f32.mrb[23].mxu0  ;;  %v1547_v10 = vsel %vm1528_vm13, %v3964_v50, -inf  ;;  %v1493_v43 = vunpack.c.l.b16 %v1477_v20 }
 0x26c   : > { %v1534_v37 = vrot.slane %v1533_v48, 2  ;;  %v1557_v4 = vsel %vm1528_vm13, %v3971_v36, -inf  ;;  %v3980_v42 = vsel %vm3943_vm10, %v1239_v58, -9e+15  ;;  %v2824_v63 = vpop.f32.mrb[23].mxu1  ;;  %vm4013_vm6 = vcmp.ne.s32.totalorder %v1495_v15, 0 }
 0x26d   : > { %v1544_v1 = vmax.f32 %v1542_v34, %v1543_v57  ;;  %v1558_v11 = vmax.f32 %v1556_v44, %v1557_v4  ;;  %v1548_v12 = vsel %vm1528_vm13, %v3980_v42, -inf  ;;  %vm4043_vm7 = vcmp.ne.s32.totalorder %v1493_v43, 0 }
 0x26e   : > { %v1535_v13 = vmax.f32 %v1533_v48, %v1534_v37  ;;  %v1549_v14 = vmax.f32 %v1547_v10, %v1548_v12 }
 0x26f   : > { %v1545_v21 = vrot.slane %v1544_v1, 1  ;;  %v1559_v23 = vrot.slane %v1558_v11, 4 }
 0x270   : > { %v1536_v34 = vrot.slane %v1535_v13, 1  ;;  %v1550_v38 = vrot.slane %v1549_v14, 4  ;;  %v1359_v39 = vpop.f32.mrb[24].mxu0 }
 0x271   : > { %v1546_v9 = vmax.f32 %v1544_v1, %v1545_v21  ;;  %v1560_v27 = vmax.f32 %v1558_v11, %v1559_v23  ;;  %v4005_v45 = vsel %vm3949_vm12, %v1359_v39, -9e+15  ;;  %v1318_v40 = vpop.f32.mrb[24].mxu1  ;;  %v2841_v33 = vpop.f32.mrb[25].mxu0 }
 0x272   : > { %v1537_v58 = vmax.f32 %v1535_v13, %v1536_v34  ;;  %v1551_v59 = vmax.f32 %v1549_v14, %v1550_v38  ;;  %v1574_v54 = vsel %vm1528_vm13, %v4005_v45, -inf  ;;  %v2835_v37 = vpop.f32.mrb[25].mxu1  ;;  %v1362_v44 = vpop.f32.mrb[26].mxu0  ;;  %v4021_v1 = vsel %vm3987_vm15, %v1318_v40, -9e+15 }
 0x273   : > { %v1603_v26 = vsub.f32 %v3900_v47, %v1546_v9  ;;  %v1604_v63 = vsub.f32 %v3914_v56, %v1546_v9  ;;  %v1561_v2 = vrot.slane %v1560_v27, 2  ;;  %v1321_v10 = vpop.f32.mrb[26].mxu1  ;;  %v2842_v11 = vpop.f32.mrb[27].mxu0  ;;  %v4027_v15 = vsel %vm3991_vm2, %v1362_v44, -9e+15 }
 0x274   : > { %v1601_v12 = vsub.f32 %v3907_v52, %v1537_v58  ;;  %v1602_v13 = vsub.f32 %v3925_v41, %v1537_v58  ;;  %v1552_v14 = vrot.slane %v1551_v59, 2  ;;  %v2836_v20 = vpop.f32.mrb[27].mxu1  ;;  %v1575_v23 = vsel %vm1528_vm13, %v4027_v15, -inf }
 0x275   : > { %v1621_v47 = vmul.f32 1.442695, %v1603_v26  ;;  %v1623_v21 = vmul.f32 1.442695, %v1604_v63  ;;  %v1562_v56 = vmax.f32 %v1560_v27, %v1561_v2  ;;  %v1576_v39 = vmax.f32 %v1574_v54, %v1575_v23 }
 0x276   : > { %v1617_v16 = vmul.f32 1.442695, %v1601_v12  ;;  %v1619_v34 = vmul.f32 1.442695, %v1602_v13  ;;  %v1553_v38 = vmax.f32 %v1551_v59, %v1552_v14  ;;  %v1565_v41 = vsel %vm1528_vm13, %v4021_v1, -inf }
 0x277   : > { %3014 = vpow2.f32 %v1621_v47  ;;  %v1563_v52 = vrot.slane %v1562_v56, 1  ;;  %v4035_v28 = vsel %vm3995_vm3, %v1321_v10, -9e+15  ;;  %v1577_v40 = vrot.slane %v1576_v39, 4 }
 0x278   : > { %3016 = vpow2.f32 %v1623_v21  ;;  %v1554_v9 = vrot.slane %v1553_v38, 1  ;;  %v1566_v27 = vsel %vm1528_vm13, %v4035_v28, -inf  ;;  %v1441_v33 = vpop.f32.mrb[28].mxu0 }
 0x279   : > { %3018 = vpow2.f32 %v1617_v16  ;;  %v1564_v58 = vmax.f32 %v1562_v56, %v1563_v52  ;;  %v1567_v59 = vmax.f32 %v1565_v41, %v1566_v27  ;;  %v4041_v54 = vsel %vm3999_vm4, %v1441_v33, -9e+15  ;;  %v1400_v37 = vpop.f32.mrb[28].mxu1  ;;  %v2853_v44 = vpop.f32.mrb[29].mxu0 }
 0x27a   : > { %3020 = vpow2.f32 %v1619_v34  ;;  %v1555_v53 = vmax.f32 %v1553_v38, %v1554_v9  ;;  %v1578_v26 = vmax.f32 %v1576_v39, %v1577_v40  ;;  %v2847_v63 = vpop.f32.mrb[29].mxu1  ;;  %v1444_v2 = vpop.f32.mrb[30].mxu0  ;;  %v1592_v48 = vsel %vm1528_vm13, %v4041_v54, -inf }
 0x27b   : > { %v1607_v11 = vsub.f32 %v3960_v35, %v1564_v58  ;;  %v1608_v12 = vsub.f32 %v3971_v36, %v1564_v58  ;;  %v1568_v13 = vrot.slane %v1567_v59, 4  ;;  %v1403_v14 = vpop.f32.mrb[30].mxu1  ;;  %v2854_v20 = vpop.f32.mrb[31].mxu0  ;;  %v4055_v43 = vsel %vm4007_vm5, %v1400_v37, -9e+15 }
 0x27c   : > { %v1605_v47 = vsub.f32 %v3964_v50, %v1555_v53  ;;  %v1606_v21 = vsub.f32 %v3980_v42, %v1555_v53  ;;  %v1579_v56 = vrot.slane %v1578_v26, 2  ;;  %v2848_v23 = vpop.f32.mrb[31].mxu1  ;;  %v4059_v36 = vsel %vm4013_vm6, %v1444_v2, -9e+15 }
 0x27d   : > { %v1629_v16 = vmul.f32 1.442695, %v1607_v11  ;;  %v1631_v35 = vmul.f32 1.442695, %v1608_v12  ;;  %v1569_v34 = vmax.f32 %v1567_v59, %v1568_v13  ;;  %v1593_v50 = vsel %vm1528_vm13, %v4059_v36, -inf }
 0x27e   : > { %v1625_v38 = vmul.f32 1.442695, %v1605_v47  ;;  %v1627_v39 = vmul.f32 1.442695, %v1606_v21  ;;  %v1580_v52 = vmax.f32 %v1578_v26, %v1579_v56  ;;  %v1594_v41 = vmax.f32 %v1592_v48, %v1593_v50 }
 0x27f   : > { %3022 = vpow2.f32 %v1629_v16  ;;  %v1570_v42 = vrot.slane %v1569_v34, 2  ;;  %v4065_v57 = vsel %vm4043_vm7, %v1403_v14, -9e+15  ;;  %v1583_v4 = vsel %vm1528_vm13, %v4055_v43, -inf }
 0x280   : > { %3024 = vpow2.f32 %v1631_v35  ;;  %v1581_v9 = vrot.slane %v1580_v52, 1  ;;  %v1584_v40 = vsel %vm1528_vm13, %v4065_v57, -inf  ;;  %v1595_v58 = vrot.slane %v1594_v41, 4 }
 0x281   : > { %v4071_v27 = vpop.eup %3014  ;;  %3026 = vpow2.f32 %v1625_v38  ;;  %v1571_v33 = vmax.f32 %v1569_v34, %v1570_v42  ;;  %v1585_v59 = vmax.f32 %v1583_v4, %v1584_v40 }
 0x282   : > { %v4073_v37 = vpop.eup %3016  ;;  %v1658_v44 = vsel %vm1528_vm13, %v4071_v27, 0.0  ;;  %3028 = vpow2.f32 %v1627_v39  ;;  %v1582_v53 = vmax.f32 %v1580_v52, %v1581_v9  ;;  %v1596_v10 = vmax.f32 %v1594_v41, %v1595_v58 }
 0x283   : > { %v4077_v26 = vpop.eup %3018  ;;  %v1659_v63 = vsel %vm1528_vm13, %v4073_v37, 0.0  ;;  %v1572_v2 = vrot.slane %v1571_v33, 1  ;;  %v1586_v11 = vrot.slane %v1585_v59, 4 }
 0x284   : > { %v4081_v12 = vpop.eup %3020  ;;  %v1660_v13 = vadd.f32 %v1659_v63, %v1658_v44  ;;  %v1649_v48 = vsel %vm1528_vm13, %v4077_v26, 0.0  ;;  %v1611_v14 = vsub.f32 %v4005_v45, %v1582_v53  ;;  %v1612_v20 = vsub.f32 %v4027_v15, %v1582_v53 }
 0x285   : > { %v1650_v47 = vsel %vm1528_vm13, %v4081_v12, 0.0  ;;  %v1573_v21 = vmax.f32 %v1571_v33, %v1572_v2  ;;  %v1597_v56 = vrot.slane %v1596_v10, 2  ;;  %v1587_v23 = vmax.f32 %v1585_v59, %v1586_v11 }
 0x286   : > { %v1661_v16 = vrot.slane %v1660_v13, 4  ;;  %v1651_v35 = vadd.f32 %v1650_v47, %v1649_v48  ;;  %v1637_v34 = vmul.f32 1.442695, %v1611_v14  ;;  %v1639_v38 = vmul.f32 1.442695, %v1612_v20 }
 0x287   : > { %v1609_v39 = vsub.f32 %v4021_v1, %v1573_v21  ;;  %v1610_v52 = vsub.f32 %v4035_v28, %v1573_v21  ;;  %v1598_v50 = vmax.f32 %v1596_v10, %v1597_v56  ;;  %v1588_v42 = vrot.slane %v1587_v23, 2 }
 0x288   : > { %v1662_v41 = vadd.f32 %v1661_v16, %v1660_v13  ;;  %v1652_v45 = vrot.slane %v1651_v35, 4  ;;  %3030 = vpow2.f32 %v1637_v34 }
 0x289   : > { %v4091_v15 = vpop.eup %3022  ;;  %3032 = vpow2.f32 %v1639_v38  ;;  %v1633_v9 = vmul.f32 1.442695, %v1609_v39  ;;  %v1635_v4 = vmul.f32 1.442695, %v1610_v52  ;;  %v1599_v40 = vrot.slane %v1598_v50, 1 }
 0x28a   : > { %v4093_v33 = vpop.eup %3024  ;;  %v1663_v58 = vrot.slane %v1662_v41, 2  ;;  %v1653_v59 = vadd.f32 %v1652_v45, %v1651_v35  ;;  %v1676_v1 = vsel %vm1528_vm13, %v4091_v15, 0.0  ;;  %v1589_v63 = vmax.f32 %v1587_v23, %v1588_v42 }
 0x28b   : > { %v4097_v44 = vpop.eup %3026  ;;  %v1677_v28 = vsel %vm1528_vm13, %v4093_v33, 0.0  ;;  %3034 = vpow2.f32 %v1633_v9  ;;  %v1600_v53 = vmax.f32 %v1598_v50, %v1599_v40 }
 0x28c   : > { %v4101_v2 = vpop.eup %3028  ;;  %v1664_v10 = vadd.f32 %v1663_v58, %v1662_v41  ;;  %v1654_v11 = vrot.slane %v1653_v59, 2  ;;  %v1678_v13 = vadd.f32 %v1677_v28, %v1676_v1  ;;  %v1667_v48 = vsel %vm1528_vm13, %v4097_v44, 0.0 }
 0x28d   : > { %v1668_v14 = vsel %vm1528_vm13, %v4101_v2, 0.0  ;;  %3036 = vpow2.f32 %v1635_v4  ;;  %v1615_v20 = vsub.f32 %v4041_v54, %v1600_v53  ;;  %v1616_v47 = vsub.f32 %v4059_v36, %v1600_v53 }
 0x28e   : > { %v1665_v21 = vrot.slane %v1664_v10, 1  ;;  %v1655_v56 = vadd.f32 %v1654_v11, %v1653_v59  ;;  %v1679_v16 = vrot.slane %v1678_v13, 4  ;;  %v1669_v23 = vadd.f32 %v1668_v14, %v1667_v48 }
 0x28f   : > { %v1645_v35 = vmul.f32 1.442695, %v1615_v20  ;;  %v1647_v34 = vmul.f32 1.442695, %v1616_v47  ;;  %v1590_v38 = vrot.slane %v1589_v63, 1 }
 0x290   : > { %v1666_v39 = vadd.f32 %v1665_v21, %v1664_v10  ;;  %v1656_v52 = vrot.slane %v1655_v56, 1  ;;  %v1680_v50 = vadd.f32 %v1679_v16, %v1678_v13  ;;  %v1670_v42 = vrot.slane %v1669_v23, 4 }
 0x291   : > { %3038 = vpow2.f32 %v1645_v35  ;;  %v1591_v41 = vmax.f32 %v1589_v63, %v1590_v38  ;;  %v1747_v38 = vunpack.c.l.bf16 %v3815_v5 }
 0x292   : > { %v4109_v45 = vpop.eup %3030  ;;  %3040 = vrcp.f32 %v1666_v39  ;;  %v1657_v9 = vadd.f32 %v1656_v52, %v1655_v56  ;;  %v1681_v54 = vrot.slane %v1680_v50, 2  ;;  %v1671_v4 = vadd.f32 %v1670_v42, %v1669_v23 }
 0x293   : > { %v4111_v36 = vpop.eup %3032  ;;  %v1694_v40 = vsel %vm1528_vm13, %v4109_v45, 0.0  ;;  %3042 = vpow2.f32 %v1647_v34  ;;  %v1613_v58 = vsub.f32 %v4055_v43, %v1591_v41  ;;  %v1614_v59 = vsub.f32 %v4065_v57, %v1591_v41 }
 0x294   : > { %3044 = vrcp.f32 %v1657_v9  ;;  %v1682_v1 = vadd.f32 %v1681_v54, %v1680_v50  ;;  %v1672_v28 = vrot.slane %v1671_v4, 2  ;;  %v1695_v53 = vsel %vm1528_vm13, %v4111_v36, 0.0 }
 0x295   : > { %v4119_v63 = vpop.eup %3034  ;;  %v1696_v10 = vadd.f32 %v1695_v53, %v1694_v40  ;;  %v1641_v11 = vmul.f32 1.442695, %v1613_v58  ;;  %v1643_v13 = vmul.f32 1.442695, %v1614_v59  ;;  %v1748_v39 = vunpack.c.l.bf16 %v3821_v7 }
 0x296   : > { %v1683_v48 = vrot.slane %v1682_v1, 1  ;;  %v1673_v14 = vadd.f32 %v1672_v28, %v1671_v4  ;;  %v1685_v20 = vsel %vm1528_vm13, %v4119_v63, 0.0  ;;  %v1745_v41 = vunpack.c.l.bf16 %v3818_v6 }
 0x297   : > { %v4123_v47 = vpop.eup %3036  ;;  %v1697_v43 = vrot.slane %v1696_v10, 4  ;;  %3046 = vpow2.f32 %v1641_v11  ;;  %v1746_v9 = vunpack.c.l.bf16 %v3824_v8 }
 0x298   : > { %v1684_v57 = vadd.f32 %v1683_v48, %v1682_v1  ;;  %v1674_v21 = vrot.slane %v1673_v14, 1  ;;  %v1686_v56 = vsel %vm1528_vm13, %v4123_v47, 0.0  ;;  %3048 = vpow2.f32 %v1643_v13 }
 0x299   : > { %v1698_v16 = vadd.f32 %v1697_v43, %v1696_v10  ;;  %v1687_v23 = vadd.f32 %v1686_v56, %v1685_v20 }
 0x29a   : > { %3050 = vrcp.f32 %v1684_v57  ;;  %v1675_v35 = vadd.f32 %v1674_v21, %v1673_v14 }
 0x29b   : > { %v4127_v34 = vpop.eup %3038  ;;  %v1699_v52 = vrot.slane %v1698_v16, 2  ;;  %v1688_v50 = vrot.slane %v1687_v23, 4 }
 0x29c   : > { %v3041_v42 = vpop.eup %3040  ;;  %3052 = vrcp.f32 %v1675_v35  ;;  %v1712_v54 = vsel %vm1528_vm13, %v4127_v34, 0.0 }
 0x29d   : > { %v4135_v4 = vpop.eup %3042  ;;  %v1731_v40 = vmul.f32 %v3041_v42, %v4071_v27  ;;  %v1732_v58 = vmul.f32 %v3041_v42, %v4073_v37  ;;  %v1700_v5 = vadd.f32 %v1699_v52, %v1698_v16  ;;  %v1689_v59 = vadd.f32 %v1688_v50, %v1687_v23 }
 0x29e   : > { %v3045_v7 = vpop.eup %3044  ;;  %v1713_v1 = vsel %vm1528_vm13, %v4135_v4, 0.0  ;;  %v1749_v50 = vunpack.c.l.bf16 %v3831_v0  ;;  %v1750_v42 = vunpack.c.l.bf16 %v3848_v18 }
 0x29f   : > { %v1763_v28 = vmul.f32 %v1747_v38, %v1731_v40  ;;  %v1764_v6 = vmul.f32 %v1748_v39, %v1732_v58  ;;  %v1729_v8 = vmul.f32 %v3045_v7, %v4077_v26  ;;  %v1730_v53 = vmul.f32 %v3045_v7, %v4081_v12 }
 0x2a0   : > { %v1701_v10 = vrot.slane %v1700_v5, 1  ;;  %v1690_v11 = vrot.slane %v1689_v59, 2  ;;  %v1714_v13 = vadd.f32 %v1713_v1, %v1712_v54  ;;  %v1751_v26 = vunpack.c.l.bf16 %v3828_v61 }
 0x2a1   : > { %v4143_v48 = vpop.eup %3046  ;;  %v1778_v27 = vpack.c.bf16 %v1764_v6, %v1763_v28  ;;  %v1761_v14 = vmul.f32 %v1745_v41, %v1729_v8  ;;  %v1762_v37 = vmul.f32 %v1746_v9, %v1730_v53  ;;  %v1752_v12 = vunpack.c.l.bf16 %v3845_v17 }
 0x2a2   : > { %v4145_v20 = vpop.eup %3048  ;;  %v1702_v43 = vadd.f32 %v1701_v10, %v1700_v5  ;;  %v1691_v57 = vadd.f32 %v1690_v11, %v1689_v59  ;;  %v1715_v21 = vrot.slane %v1714_v13, 4  ;;  %v1703_v56 = vsel %vm1528_vm13, %v4143_v48, 0.0 }
 0x2a3   : > { %v1777_v16 = vpack.c.bf16 %v1762_v37, %v1761_v14  ;;  %v1704_v23 = vsel %vm1528_vm13, %v4145_v20, 0.0  ;;  %2864 = vmatmul.mubr.msk.bf16.vlgmr.msra.gmra.mrb[32].mxu0 %vm1528_vm13, %v1778_v27  ;;  %v1754_v14 = vunpack.c.l.bf16 %v3868_v30  ;;  %v1760_v30 = vunpack.c.l.bf16 %v3917_v3 }
 0x2a4   : > { %v3051_v35 = vpop.eup %3050  ;;  %3054 = vrcp.f32 %v1702_v43  ;;  %v1692_v38 = vrot.slane %v1691_v57, 1  ;;  %v1716_v39 = vadd.f32 %v1715_v21, %v1714_v13  ;;  %v1705_v52 = vadd.f32 %v1704_v23, %v1703_v56  ;;  %2874 = vmatpush3.bf16.msra.mxu0 %v3689_v19  ;;  %2875 = vmatprep.mubr.msk.bf16.mxu0 %vm3314_vm1, %v3313_v31 }
 0x2a5   : > { %v1735_v61 = vmul.f32 %v3051_v35, %v4091_v15  ;;  %v1736_v17 = vmul.f32 %v3051_v35, %v4093_v33  ;;  %2858 = vmatmul.mubr.msk.bf16.vlgmr.msra.gmra.mrb[32].mxu1 %vm1528_vm13, %v1777_v16  ;;  %2885 = vmatprep.subr.bf16.mxu0 %v3313_v31 }
 0x2a6   : > { %v3053_v41 = vpop.eup %3052  ;;  %v1693_v9 = vadd.f32 %v1692_v38, %v1691_v57  ;;  %v1717_v54 = vrot.slane %v1716_v39, 2  ;;  %v1706_v40 = vrot.slane %v1705_v52, 4  ;;  %2868 = vmatpush3.bf16.msra.mxu1 %v3694_v22  ;;  %2869 = vmatprep.mubr.msk.bf16.mxu1 %vm3314_vm1, %v3313_v31 }
 0x2a7   : > { %v1767_v19 = vmul.f32 %v1751_v26, %v1735_v61  ;;  %v1768_v0 = vmul.f32 %v1752_v12, %v1736_v17  ;;  %v1733_v15 = vmul.f32 %v3053_v41, %v4097_v44  ;;  %v1734_v33 = vmul.f32 %v3053_v41, %v4101_v2  ;;  %2879 = vmatprep.subr.bf16.mxu1 %v3313_v31  ;;  %v4228_v17 = vld [vmem:[%s3562_s27] sm:$0xff] }
 0x2a8   : > { %3056 = vrcp.f32 %v1693_v9  ;;  %v1718_v18 = vadd.f32 %v1717_v54, %v1716_v39  ;;  %v1707_v58 = vadd.f32 %v1706_v40, %v1705_v52  ;;  %v1755_v44 = vunpack.c.l.bf16 %v3851_v24  ;;  %v4219_v39 = vld [vmem:[%s3562_s27 + $0x10] sm:$0xff] }
 0x2a9   : > { %v1780_v5 = vpack.c.bf16 %v1768_v0, %v1767_v19  ;;  %v1765_v59 = vmul.f32 %v1749_v50, %v1733_v15  ;;  %v1766_v7 = vmul.f32 %v1750_v42, %v1734_v33  ;;  %v1756_v2 = vunpack.c.l.bf16 %v3865_v29  ;;  %v4238_v0 = vld [vmem:[%s3562_s27 + $0x18] sm:$0xff] }
 0x2aa   : > { %v1719_v1 = vrot.slane %v1718_v18, 1  ;;  %v1708_v28 = vrot.slane %v1707_v58, 2  ;;  %v1753_v29 = vunpack.c.l.bf16 %v3854_v25 }
 0x2ab   : > { %v1779_v22 = vpack.c.bf16 %v1766_v7, %v1765_v59  ;;  %2876 = vmatmul.mubr.msk.bf16.vlgmr.msra.gmra.mrb[36].mxu0 %vm1528_vm13, %v1780_v5 }
 0x2ac   : > { %v1720_v6 = vadd.f32 %v1719_v1, %v1718_v18  ;;  %v1709_v8 = vadd.f32 %v1708_v28, %v1707_v58  ;;  %2886 = vmatpush3.bf16.msra.mxu0 %v3719_v46  ;;  %2887 = vmatprep.mubr.msk.bf16.mxu0 %vm3314_vm1, %v3313_v31  ;;  %v4245_v18 = vld [vmem:[%s3562_s27 + $0x8] sm:$0xff] }
 0x2ad   : > { %2870 = vmatmul.mubr.msk.bf16.vlgmr.msra.gmra.mrb[36].mxu1 %vm1528_vm13, %v1779_v22  ;;  %2897 = vmatprep.subr.bf16.mxu0 %v3313_v31 }
 0x2ae   : > { %v3055_v53 = vpop.eup %3054  ;;  %3058 = vrcp.f32 %v1720_v6  ;;  %v1710_v10 = vrot.slane %v1709_v8, 1  ;;  %2880 = vmatpush3.bf16.msra.mxu1 %v3724_v49  ;;  %2881 = vmatprep.mubr.msk.bf16.mxu1 %vm3314_vm1, %v3313_v31 }
 0x2af   : > { %v1739_v46 = vmul.f32 %v3055_v53, %v4109_v45  ;;  %v1740_v11 = vmul.f32 %v3055_v53, %v4111_v36  ;;  %2891 = vmatprep.subr.bf16.mxu1 %v3313_v31  ;;  %v1759_v36 = vunpack.c.l.bf16 %v3903_v51  ;;  %v1758_v51 = vunpack.c.l.bf16 %v3956_v32  ;;  %v4213_v32 = vld [vmem:[%s4567_s7] ss:$0 sm:$0xff] }
 0x2b0   : > { %v1711_v24 = vadd.f32 %v1710_v10, %v1709_v8 }
 0x2b1   : > { %v1771_v13 = vmul.f32 %v1755_v44, %v1739_v46  ;;  %v1772_v27 = vmul.f32 %v1756_v2, %v1740_v11 }
 0x2b2   : > { %v3057_v37 = vpop.eup %3056  ;;  %3060 = vrcp.f32 %v1711_v24  ;;  %v4265_v24 = vld [vmem:[%s3562_s27 + $0x30] sm:$0xff] }
 0x2b3   : > { %v1782_v43 = vpack.c.bf16 %v1772_v27, %v1771_v13  ;;  %v1737_v49 = vmul.f32 %v3057_v37, %v4119_v63  ;;  %v1738_v57 = vmul.f32 %v3057_v37, %v4123_v47 }
 0x2b5   : > { %v1769_v21 = vmul.f32 %v1753_v29, %v1737_v49  ;;  %v1770_v45 = vmul.f32 %v1754_v14, %v1738_v57  ;;  %2888 = vmatmul.mubr.msk.bf16.vlgmr.msra.gmra.mrb[40].mxu0 %vm1528_vm13, %v1782_v43  ;;  %v4274_v14 = vld [vmem:[%s3562_s27 + $0x38] sm:$0xff] }
 0x2b6   : > { %2898 = vmatpush3.bf16.msra.mxu0 %v3743_v60  ;;  %2899 = vmatprep.mubr.msk.bf16.mxu0 %vm3314_vm1, %v3313_v31  ;;  %v1757_v60 = vunpack.c.l.bf16 %v3910_v55  ;;  %v4208_v55 = vld [vmem:[%s4566_s6] ss:$0 sm:$0xff] }
 0x2b7   : > { %v1781_v25 = vpack.c.bf16 %v1770_v45, %v1769_v21  ;;  %v2161_v52 = vmul.f32 %v4219_v39, %v4208_v55  ;;  %v2159_v42 = vmul.f32 %v4228_v17, %v4208_v55  ;;  %v2162_v15 = vmul.f32 %v4238_v0, %v4208_v55 }
 0x2b8   : > { %v3059_v56 = vpop.eup %3058  ;;  %v2160_v58 = vmul.f32 %v4245_v18, %v4208_v55  ;;  %v2165_v29 = vmul.f32 %v4265_v24, %v4208_v55  ;;  %v2166_v37 = vmul.f32 %v4274_v14, %v4208_v55 }
 0x2b9   : > { %v1743_v16 = vmul.f32 %v3059_v56, %v4127_v34  ;;  %v1744_v63 = vmul.f32 %v3059_v56, %v4135_v4  ;;  %2882 = vmatmul.mubr.msk.bf16.vlgmr.msra.gmra.mrb[40].mxu1 %vm1528_vm13, %v1781_v25  ;;  %v4288_v56 = vld [vmem:[%s3562_s27 + $0x20] sm:$0xff] }
 0x2ba   : > { %2892 = vmatpush3.bf16.msra.mxu1 %v3745_v62  ;;  %2893 = vmatprep.mubr.msk.bf16.mxu1 %vm3314_vm1, %v3313_v31  ;;  %v459_v31 = vld [vmem:[#allocation2] sm:$0x1] }
 0x2bb   : > { %v1775_v47 = vmul.f32 %v1759_v36, %v1743_v16  ;;  %v1776_v26 = vmul.f32 %v1760_v30, %v1744_v63  ;;  %2937 = vpush %v459_v31  ;;  %v2163_v16 = vmul.f32 %v4288_v56, %v4208_v55  ;;  %v4293_v63 = vld [vmem:[%s3562_s27 + $0x28] sm:$0xff] }
 0x2bc   : > { %v3061_v12 = vpop.eup %3060 }
 0x2bd   : > { %v1784_v3 = vpack.c.bf16 %v1776_v26, %v1775_v47  ;;  %v1741_v34 = vmul.f32 %v3061_v12, %v4143_v48  ;;  %v1742_v4 = vmul.f32 %v3061_v12, %v4145_v20 }
 0x2bf   : > { %v1773_v23 = vmul.f32 %v1757_v60, %v1741_v34  ;;  %v1774_v35 = vmul.f32 %v1758_v51, %v1742_v4  ;;  %2900 = vmatmul.mubr.msk.bf16.vlgmr.msra.gmra.mrb[44].mxu0 %vm1528_vm13, %v1784_v3  ;;  %v2164_v60 = vmul.f32 %v4293_v63, %v4208_v55 }
 0x2c1   : > { %v1783_v62 = vpack.c.bf16 %v1774_v35, %v1773_v23 }
 0x2c3   : > { %2894 = vmatmul.mubr.msk.bf16.vlgmr.msra.gmra.mrb[44].mxu1 %vm1528_vm13, %v1783_v62 }
 0x376   : > { %v4215_v48 = vpop.f32.mrb[32].mxu0 }
 0x377   : > { %v2139_v20 = vmax.f32 %v4215_v48, 0.0  ;;  %v2865_v38 = vpop.f32.mrb[33].mxu0 }
 0x378   : > { %v4223_v50 = vpop.f32.mrb[32].mxu1  ;;  %v4225_v61 = vpop.f32.mrb[34].mxu0 }
 0x379   : > { %v2183_v41 = vmul.f32 %v4213_v32, %v2139_v20  ;;  %v2137_v9 = vmax.f32 %v4223_v50, 0.0  ;;  %v2859_v54 = vpop.f32.mrb[33].mxu1  ;;  %v2140_v40 = vmax.f32 %v4225_v61, 0.0  ;;  %v2866_v19 = vpop.f32.mrb[35].mxu0 }
 0x37a   : > { %v4242_v33 = vpop.f32.mrb[34].mxu1 }
 0x37b   : > { %v2181_v5 = vmul.f32 %v4213_v32, %v2137_v9  ;;  %v2184_v59 = vmul.f32 %v4213_v32, %v2140_v40  ;;  %v2138_v7 = vmax.f32 %v4242_v33, 0.0  ;;  %v2860_v1 = vpop.f32.mrb[35].mxu1  ;;  %v2199_v28 = vadd.f32 %v2183_v41, %v2161_v52  ;;  %v4313_v41 = vld [vmem:[%s3562_s27 + $0x50] sm:$0xff] }
 0x37c   : > { %v2169_v54 = vmul.f32 %v4313_v41, %v4208_v55 }
 0x37d   : > { %v2182_v22 = vmul.f32 %v4213_v32, %v2138_v7  ;;  %v2219_v6 = vsel %vm485_vm0, %v2199_v28, 0.0  ;;  %v2197_v8 = vadd.f32 %v2181_v5, %v2159_v42  ;;  %v2200_v44 = vadd.f32 %v2184_v59, %v2162_v15  ;;  %v4320_v15 = vld [vmem:[%s3562_s27 + $0x58] sm:$0xff] }
 0x37e   : > { %2220 = vadd.xlane.f32.xlu1 %v2219_v6  ;;  %v4260_v2 = vpop.f32.mrb[36].mxu0 }
 0x37f   : > { %v2143_v53 = vmax.f32 %v4260_v2, 0.0  ;;  %v2877_v10 = vpop.f32.mrb[37].mxu0  ;;  %v2213_v46 = vsel %vm485_vm0, %v2197_v8, 0.0  ;;  %v2198_v11 = vadd.f32 %v2182_v22, %v2160_v58  ;;  %v2222_v25 = vsel %vm485_vm0, %v2200_v44, 0.0 }
 0x380   : > { %2214 = vadd.xlane.f32.xlu0 %v2213_v46  ;;  %v4269_v13 = vpop.f32.mrb[36].mxu1  ;;  %v4271_v27 = vpop.f32.mrb[38].mxu0  ;;  %v2170_v58 = vmul.f32 %v4320_v15, %v4208_v55 }
 0x381   : > { %v2187_v43 = vmul.f32 %v4213_v32, %v2143_v53  ;;  %v2141_v49 = vmax.f32 %v4269_v13, 0.0  ;;  %v2871_v57 = vpop.f32.mrb[37].mxu1  ;;  %v2144_v21 = vmax.f32 %v4271_v27, 0.0  ;;  %v2878_v45 = vpop.f32.mrb[39].mxu0  ;;  %v2216_v30 = vsel %vm485_vm0, %v2198_v11, 0.0  ;;  %v4337_v11 = vld [vmem:[%s3562_s27 + $0x40] sm:$0xff] }
 0x382   : > { %v4284_v36 = vpop.f32.mrb[38].mxu1  ;;  %2223 = vadd.xlane.f32.xlu1 %v2222_v25 }
 0x383   : > { %v2185_v47 = vmul.f32 %v4213_v32, %v2141_v49  ;;  %v2188_v26 = vmul.f32 %v4213_v32, %v2144_v21  ;;  %v2142_v51 = vmax.f32 %v4284_v36, 0.0  ;;  %v2872_v12 = vpop.f32.mrb[39].mxu1  ;;  %v2203_v3 = vadd.f32 %v2187_v43, %v2165_v29  ;;  %v4344_v43 = vld [vmem:[%s3562_s27 + $0x48] sm:$0xff] }
 0x384   : > { %2217 = vadd.xlane.f32.xlu0 %v2216_v30  ;;  %v2167_v29 = vmul.f32 %v4337_v11, %v4208_v55  ;;  %v2168_v57 = vmul.f32 %v4344_v43, %v4208_v55 }
 0x385   : > { %v2186_v34 = vmul.f32 %v4213_v32, %v2142_v51  ;;  %v2231_v4 = vsel %vm485_vm0, %v2203_v3, 0.0  ;;  %v2204_v23 = vadd.f32 %v2188_v26, %v2166_v37  ;;  %v2201_v62 = vadd.f32 %v2185_v47, %v2163_v16 }
 0x387   : > { %v2234_v35 = vsel %vm485_vm0, %v2204_v23, 0.0  ;;  %v2202_v31 = vadd.f32 %v2186_v34, %v2164_v60  ;;  %v2225_v28 = vsel %vm485_vm0, %v2201_v62, 0.0 }
 0x388   : > { %v4309_v38 = vpop.f32.mrb[40].mxu0  ;;  %2232 = vadd.xlane.f32.xlu0 %v2231_v4  ;;  %2235 = vadd.xlane.f32.xlu1 %v2234_v35 }
 0x389   : > { %v2147_v52 = vmax.f32 %v4309_v38, 0.0  ;;  %v2889_v42 = vpop.f32.mrb[41].mxu0  ;;  %v2228_v22 = vsel %vm485_vm0, %v2202_v31, 0.0 }
 0x38a   : > { %v4317_v19 = vpop.f32.mrb[42].mxu0 }
 0x38b   : > { %v2191_v5 = vmul.f32 %v4213_v32, %v2147_v52  ;;  %v2148_v59 = vmax.f32 %v4317_v19, 0.0  ;;  %v2890_v1 = vpop.f32.mrb[43].mxu0 }
 0x38c   : > { %v4330_v6 = vpop.f32.mrb[40].mxu1  ;;  %2226 = vadd.xlane.f32.xlu0 %v2225_v28  ;;  %2229 = vadd.xlane.f32.xlu1 %v2228_v22  ;;  %v4369_v28 = vld [vmem:[%s3562_s27 + $0x60] sm:$0xff] }
 0x38d   : > { %v2145_v8 = vmax.f32 %v4330_v6, 0.0  ;;  %v2883_v44 = vpop.f32.mrb[41].mxu1  ;;  %v2192_v10 = vmul.f32 %v4213_v32, %v2148_v59  ;;  %v2207_v46 = vadd.f32 %v2191_v5, %v2169_v54  ;;  %v2171_v22 = vmul.f32 %v4369_v28, %v4208_v55 }
 0x38e   : > { %v4341_v37 = vpop.f32.mrb[42].mxu1 }
 0x38f   : > { %v2189_v45 = vmul.f32 %v4213_v32, %v2145_v8  ;;  %v2146_v25 = vmax.f32 %v4341_v37, 0.0  ;;  %v2884_v30 = vpop.f32.mrb[43].mxu1  ;;  %v2243_v16 = vsel %vm485_vm0, %v2207_v46, 0.0  ;;  %v2208_v60 = vadd.f32 %v2192_v10, %v2170_v58  ;;  %v4376_v10 = vld [vmem:[%s3562_s27 + $0x70] sm:$0xff] }
 0x390   : > { %2244 = vadd.xlane.f32.xlu0 %v2243_v16  ;;  %v2173_v46 = vmul.f32 %v4376_v10, %v4208_v55  ;;  %v4388_v16 = vld [vmem:[%s3562_s27 + $0x68] sm:$0xff] }
 0x391   : > { %v2190_v47 = vmul.f32 %v4213_v32, %v2146_v25  ;;  %v2246_v26 = vsel %vm485_vm0, %v2208_v60, 0.0  ;;  %v2205_v12 = vadd.f32 %v2189_v45, %v2167_v29  ;;  %v2172_v60 = vmul.f32 %v4388_v16, %v4208_v55 }
 0x392   : > { %v4357_v3 = vpop.f32.mrb[44].mxu0  ;;  %2247 = vadd.xlane.f32.xlu1 %v2246_v26 }
 0x393   : > { %v2901_v34 = vpop.f32.mrb[45].mxu0  ;;  %v2237_v4 = vsel %vm485_vm0, %v2205_v12, 0.0  ;;  %v2206_v23 = vadd.f32 %v2190_v47, %v2168_v57  ;;  %v4580_v62 = vmax.f32 %v4357_v3, 0.0 }
 0x394   : > { %v4360_v35 = vpop.f32.mrb[46].mxu0  ;;  %2238 = vadd.xlane.f32.xlu0 %v2237_v4  ;;  %v4399_v34 = vld [vmem:[%s3562_s27 + $0x78] sm:$0xff]  ;;  %s2938_s27 = spop %2937 }
 0x395   : > { %v2902_v31 = vpop.f32.mrb[47].mxu0  ;;  %v2240_v42 = vsel %vm485_vm0, %v2206_v23, 0.0  ;;  %v4579_v5 = vmax.f32 %v4360_v35, 0.0  ;;  %v2195_v29 = vmul.f32 %v4213_v32, %v4580_v62  ;;  %v2174_v4 = vmul.f32 %v4399_v34, %v4208_v55 }
 0x396   : > { %v4364_v54 = vpop.f32.mrb[44].mxu1  ;;  %2241 = vadd.xlane.f32.xlu1 %v2240_v42 }
 0x397   : > { %v4582_v58 = vmax.f32 %v4364_v54, 0.0  ;;  %v2895_v1 = vpop.f32.mrb[45].mxu1  ;;  %v2196_v47 = vmul.f32 %v4213_v32, %v4579_v5  ;;  %v2211_v42 = vadd.f32 %v2195_v29, %v2173_v46 }
 0x398   : > { %v4373_v44 = vpop.f32.mrb[46].mxu1 }
 0x399   : > { %v2193_v57 = vmul.f32 %v4213_v32, %v4582_v58  ;;  %v4581_v45 = vmax.f32 %v4373_v44, 0.0  ;;  %v2896_v30 = vpop.f32.mrb[47].mxu1  ;;  %v2255_v5 = vsel %vm485_vm0, %v2211_v42, 0.0 }
 0x39a   : > { %v2212_v30 = vadd.f32 %v2196_v47, %v2174_v4 }
 0x39b   : > { %v2194_v26 = vmul.f32 %v4213_v32, %v4581_v45  ;;  %v2209_v12 = vadd.f32 %v2193_v57, %v2171_v22  ;;  %v4407_v22 = vstv %s2938_s27 }
 0x39c   : > { %v2258_v32 = vsel %vm485_vm0, %v2212_v30, 0.0 }
 0x39d   : > { %v2249_v23 = vsel %vm485_vm0, %v2209_v12, 0.0  ;;  %v2210_v31 = vadd.f32 %v2194_v26, %v2172_v60 }
 0x39e   : > { %2250 = vadd.xlane.f32.xlu0 %v2249_v23 }
 0x39f   : > { %v2252_v1 = vsel %vm485_vm0, %v2210_v31, 0.0 }
 0x3a0   : > { %2253 = vadd.xlane.f32.xlu1 %v2252_v1 }
 0x3a2   : > { %2256 = vadd.xlane.f32.xlu0 %v2255_v5 }
 0x3a4   : > { %2259 = vadd.xlane.f32.xlu1 %v2258_v32 }
 0x40b   : > { %v2221_v57 = vpop.xlane.xlu1 %2220 }
 0x40c   : > { %v2264_v55 = vadd.f32 %v4407_v22, %v2221_v57 }
 0x40d   : > { %v2215_v12 = vpop.xlane.xlu0 %2214 }
 0x40e   : > { %v2280_v60 = vsub.f32 0.0, %v2264_v55  ;;  %v2262_v46 = vadd.f32 %v4407_v22, %v2215_v12 }
 0x40f   : > { %v2224_v29 = vpop.xlane.xlu1 %2223 }
 0x410   : > { %v2298_v26 = vmul.f32 1.442695, %v2280_v60  ;;  %v2278_v47 = vsub.f32 0.0, %v2262_v46  ;;  %v2265_v4 = vadd.f32 %v4407_v22, %v2224_v29 }
 0x411   : > { %v2218_v23 = vpop.xlane.xlu0 %2217 }
 0x412   : > { %3062 = vpow2.f32 %v2298_v26  ;;  %v2294_v5 = vmul.f32 1.442695, %v2278_v47  ;;  %v2281_v31 = vsub.f32 0.0, %v2265_v4  ;;  %v2263_v42 = vadd.f32 %v4407_v22, %v2218_v23 }
 0x414   : > { %3064 = vpow2.f32 %v2294_v5  ;;  %v2300_v1 = vmul.f32 1.442695, %v2281_v31  ;;  %v2279_v30 = vsub.f32 0.0, %v2263_v42 }
 0x415   : > { %v2233_v32 = vpop.xlane.xlu0 %2232  ;;  %v2236_v57 = vpop.xlane.xlu1 %2235 }
 0x416   : > { %3066 = vpow2.f32 %v2300_v1  ;;  %v2296_v55 = vmul.f32 1.442695, %v2279_v30  ;;  %v2268_v12 = vadd.f32 %v4407_v22, %v2233_v32  ;;  %v2269_v60 = vadd.f32 %v4407_v22, %v2236_v57 }
 0x418   : > { %3068 = vpow2.f32 %v2296_v55  ;;  %v2284_v46 = vsub.f32 0.0, %v2268_v12  ;;  %v2285_v29 = vsub.f32 0.0, %v2269_v60 }
 0x419   : > { %v2227_v62 = vpop.xlane.xlu0 %2226  ;;  %v2230_v26 = vpop.xlane.xlu1 %2229 }
 0x41a   : > { %v2306_v47 = vmul.f32 1.442695, %v2284_v46  ;;  %v2308_v4 = vmul.f32 1.442695, %v2285_v29  ;;  %v2266_v23 = vadd.f32 %v4407_v22, %v2227_v62  ;;  %v2267_v5 = vadd.f32 %v4407_v22, %v2230_v26 }
 0x41c   : > { %v3063_v31 = vpop.eup %3062  ;;  %3070 = vpow2.f32 %v2306_v47  ;;  %v2282_v42 = vsub.f32 0.0, %v2266_v23  ;;  %v2283_v1 = vsub.f32 0.0, %v2267_v5 }
 0x41d   : > { %v2328_v30 = vadd.f32 1.0, %v3063_v31  ;;  %3072 = vpow2.f32 %v2308_v4  ;;  %v2245_v32 = vpop.xlane.xlu0 %2244 }
 0x41e   : > { %v3065_v45 = vpop.eup %3064  ;;  %v2302_v57 = vmul.f32 1.442695, %v2282_v42  ;;  %v2304_v55 = vmul.f32 1.442695, %v2283_v1  ;;  %v2272_v12 = vadd.f32 %v4407_v22, %v2245_v32 }
 0x41f   : > { %3074 = vrcp.f32 %v2328_v30  ;;  %v2326_v60 = vadd.f32 1.0, %v3065_v45  ;;  %v2248_v46 = vpop.xlane.xlu1 %2247 }
 0x420   : > { %v3067_v29 = vpop.eup %3066  ;;  %3076 = vpow2.f32 %v2302_v57  ;;  %v2288_v62 = vsub.f32 0.0, %v2272_v12  ;;  %v2273_v26 = vadd.f32 %v4407_v22, %v2248_v46 }
 0x421   : > { %3078 = vrcp.f32 %v2326_v60  ;;  %v2329_v47 = vadd.f32 1.0, %v3067_v29  ;;  %v2239_v23 = vpop.xlane.xlu0 %2238 }
 0x422   : > { %v3069_v5 = vpop.eup %3068  ;;  %3080 = vpow2.f32 %v2304_v55  ;;  %v2314_v4 = vmul.f32 1.442695, %v2288_v62  ;;  %v2289_v31 = vsub.f32 0.0, %v2273_v26  ;;  %v2270_v42 = vadd.f32 %v4407_v22, %v2239_v23 }
 0x423   : > { %3082 = vrcp.f32 %v2329_v47  ;;  %v2327_v1 = vadd.f32 1.0, %v3069_v5  ;;  %v2242_v32 = vpop.xlane.xlu1 %2241 }
 0x424   : > { %3084 = vpow2.f32 %v2314_v4  ;;  %v2316_v45 = vmul.f32 1.442695, %v2289_v31  ;;  %v2286_v30 = vsub.f32 0.0, %v2270_v42  ;;  %v2271_v57 = vadd.f32 %v4407_v22, %v2242_v32 }
 0x425   : > { %3086 = vrcp.f32 %v2327_v1 }
 0x426   : > { %v3071_v12 = vpop.eup %3070  ;;  %3088 = vpow2.f32 %v2316_v45  ;;  %v2310_v60 = vmul.f32 1.442695, %v2286_v30  ;;  %v2287_v46 = vsub.f32 0.0, %v2271_v57 }
 0x427   : > { %v3073_v29 = vpop.eup %3072  ;;  %v2332_v58 = vadd.f32 1.0, %v3071_v12 }
 0x428   : > { %v2333_v55 = vadd.f32 1.0, %v3073_v29  ;;  %3090 = vpow2.f32 %v2310_v60  ;;  %v2312_v62 = vmul.f32 1.442695, %v2287_v46 }
 0x429   : > { %v3075_v26 = vpop.eup %3074  ;;  %3092 = vrcp.f32 %v2332_v58 }
 0x42a   : > { %v3077_v47 = vpop.eup %3076  ;;  %v2392_v23 = vsub.f32 1.0, %v3075_v26  ;;  %3094 = vrcp.f32 %v2333_v55  ;;  %v2376_v1 = vmul.f32 %v4219_v39, %v3075_v26 }
 0x42b   : > { %v3079_v5 = vpop.eup %3078  ;;  %v2330_v4 = vadd.f32 1.0, %v3077_v47  ;;  %3096 = vpow2.f32 %v2312_v62  ;;  %v2251_v31 = vpop.xlane.xlu0 %2250 }
 0x42c   : > { %v3081_v42 = vpop.eup %3080  ;;  %v2408_v32 = vmul.f32 %v2392_v23, %v2139_v20  ;;  %v2390_v45 = vsub.f32 1.0, %v3079_v5  ;;  %v2274_v30 = vadd.f32 %v4407_v22, %v2251_v31  ;;  %v2374_v12 = vmul.f32 %v4228_v17, %v3079_v5 }
 0x42d   : > { %v3083_v57 = vpop.eup %3082  ;;  %3098 = vrcp.f32 %v2330_v4  ;;  %v2331_v58 = vadd.f32 1.0, %v3081_v42  ;;  %v2254_v60 = vpop.xlane.xlu1 %2253 }
 0x42e   : > { %v3085_v46 = vpop.eup %3084  ;;  %v2424_v29 = vadd.f32 %v2408_v32, %v2376_v1  ;;  %v2406_v55 = vmul.f32 %v2390_v45, %v2137_v9  ;;  %v2377_v39 = vmul.f32 %v4238_v0, %v3083_v57  ;;  %v2393_v62 = vsub.f32 1.0, %v3083_v57 }
 0x42f   : > { %v3087_v48 = vpop.eup %3086  ;;  %3100 = vrcp.f32 %v2331_v58  ;;  %v2336_v20 = vadd.f32 1.0, %v3085_v46  ;;  %v2290_v26 = vsub.f32 0.0, %v2274_v30  ;;  %v2275_v47 = vadd.f32 %v4407_v22, %v2254_v60  ;;  %v2257_v23 = vpop.xlane.xlu0 %2256 }
 0x430   : > { %v3089_v17 = vpop.eup %3088  ;;  %2440 = vst.msk [vmem:[%s4432_s13 + $0x10] sm:$0xff] %vm485_vm0, %v2424_v29  ;;  %v2422_v50 = vadd.f32 %v2406_v55, %v2374_v12  ;;  %v2409_v9 = vmul.f32 %v2393_v62, %v2140_v40  ;;  %v2375_v0 = vmul.f32 %v4245_v18, %v3087_v48  ;;  %v2391_v5 = vsub.f32 1.0, %v3087_v48 }
 0x431   : > { %3102 = vrcp.f32 %v2336_v20  ;;  %v2337_v4 = vadd.f32 1.0, %v3089_v17  ;;  %v2318_v31 = vmul.f32 1.442695, %v2290_v26  ;;  %v2291_v42 = vsub.f32 0.0, %v2275_v47  ;;  %v2260_v1 = vpop.xlane.xlu1 %2259 }
 0x432   : > { %v3091_v32 = vpop.eup %3090  ;;  %2438 = vst.msk [vmem:[%s4432_s13] sm:$0xff] %vm485_vm0, %v2422_v50  ;;  %v2425_v45 = vadd.f32 %v2409_v9, %v2377_v39  ;;  %v2407_v30 = vmul.f32 %v2391_v5, %v2138_v7  ;;  %v2276_v57 = vadd.f32 %v4407_v22, %v2257_v23  ;;  %v2277_v61 = vadd.f32 %v4407_v22, %v2260_v1 }
 0x433   : > { %v3093_v40 = vpop.eup %3092  ;;  %3104 = vrcp.f32 %v2337_v4  ;;  %v2334_v18 = vadd.f32 1.0, %v3091_v32  ;;  %v2320_v12 = vmul.f32 1.442695, %v2291_v42 }
 0x434   : > { %v3095_v58 = vpop.eup %3094  ;;  %2441 = vst.msk [vmem:[%s4432_s13 + $0x18] sm:$0xff] %vm485_vm0, %v2425_v45  ;;  %v2423_v60 = vadd.f32 %v2407_v30, %v2375_v0  ;;  %v2396_v46 = vsub.f32 1.0, %v3093_v40  ;;  %3106 = vpow2.f32 %v2318_v31  ;;  %v2380_v55 = vmul.f32 %v4265_v24, %v3093_v40 }
 0x435   : > { %v3097_v29 = vpop.eup %3096  ;;  %v2397_v33 = vsub.f32 1.0, %v3095_v58  ;;  %3108 = vrcp.f32 %v2334_v18  ;;  %v2292_v7 = vsub.f32 0.0, %v2276_v57  ;;  %v2293_v62 = vsub.f32 0.0, %v2277_v61 }
 0x436   : > { %2439 = vst.msk [vmem:[%s4432_s13 + $0x8] sm:$0xff] %vm485_vm0, %v2423_v60  ;;  %v2412_v22 = vmul.f32 %v2396_v46, %v2143_v53  ;;  %v2335_v39 = vadd.f32 1.0, %v3097_v29  ;;  %3110 = vpow2.f32 %v2320_v12  ;;  %v2381_v20 = vmul.f32 %v4274_v14, %v3095_v58 }
 0x437   : > { %v3099_v48 = vpop.eup %3098  ;;  %v2413_v26 = vmul.f32 %v2397_v33, %v2144_v21  ;;  %v2322_v24 = vmul.f32 1.442695, %v2292_v7  ;;  %v2324_v2 = vmul.f32 1.442695, %v2293_v62 }
 0x438   : > { %v2428_v47 = vadd.f32 %v2412_v22, %v2380_v55  ;;  %v2394_v23 = vsub.f32 1.0, %v3099_v48  ;;  %3112 = vrcp.f32 %v2335_v39  ;;  %v2378_v53 = vmul.f32 %v4288_v56, %v3099_v48 }
 0x439   : > { %v3101_v17 = vpop.eup %3100  ;;  %v2429_v50 = vadd.f32 %v2413_v26, %v2381_v20  ;;  %3114 = vpow2.f32 %v2322_v24  ;;  %v4638_v39 = vmax.f32 %v4373_v44, 0.0  ;;  %v4639_v26 = vmax.f32 %v4357_v3, 0.0 }
 0x43a   : > { %2444 = vst.msk [vmem:[%s4432_s13 + $0x30] sm:$0xff] %vm485_vm0, %v2428_v47  ;;  %v2410_v9 = vmul.f32 %v2394_v23, %v2141_v49  ;;  %v2395_v14 = vsub.f32 1.0, %v3101_v17  ;;  %3116 = vpow2.f32 %v2324_v2  ;;  %v2379_v21 = vmul.f32 %v4293_v63, %v3101_v17 }
 0x43b   : > { %v3103_v0 = vpop.eup %3102  ;;  %2445 = vst.msk [vmem:[%s4432_s13 + $0x38] sm:$0xff] %vm485_vm0, %v2429_v50  ;;  %v4640_v23 = vmax.f32 %v4360_v35, 0.0 }
 0x43c   : > { %v2426_v27 = vadd.f32 %v2410_v9, %v2378_v53  ;;  %v2411_v5 = vmul.f32 %v2395_v14, %v2142_v51  ;;  %v2400_v4 = vsub.f32 1.0, %v3103_v0  ;;  %v2384_v49 = vmul.f32 %v4313_v41, %v3103_v0 }
 0x43d   : > { %v3105_v31 = vpop.eup %3104 }
 0x43e   : > { %v3107_v42 = vpop.eup %3106  ;;  %2442 = vst.msk [vmem:[%s4432_s13 + $0x20] sm:$0xff] %vm485_vm0, %v2426_v27  ;;  %v2427_v13 = vadd.f32 %v2411_v5, %v2379_v21  ;;  %v2416_v56 = vmul.f32 %v2400_v4, %v2147_v52  ;;  %v2401_v1 = vsub.f32 1.0, %v3105_v31  ;;  %v2385_v63 = vmul.f32 %v4320_v15, %v3105_v31 }
 0x43f   : > { %v3109_v32 = vpop.eup %3108  ;;  %v2338_v45 = vadd.f32 1.0, %v3107_v42 }
 0x440   : > { %v3111_v30 = vpop.eup %3110  ;;  %2443 = vst.msk [vmem:[%s4432_s13 + $0x28] sm:$0xff] %vm485_vm0, %v2427_v13  ;;  %v2432_v36 = vadd.f32 %v2416_v56, %v2384_v49  ;;  %v2417_v51 = vmul.f32 %v2401_v1, %v2148_v59  ;;  %v2398_v57 = vsub.f32 1.0, %v3109_v32  ;;  %v2382_v52 = vmul.f32 %v4337_v11, %v3109_v32 }
 0x441   : > { %3118 = vrcp.f32 %v2338_v45  ;;  %v2339_v41 = vadd.f32 1.0, %v3111_v30 }
 0x442   : > { %v3113_v61 = vpop.eup %3112  ;;  %2448 = vst.msk [vmem:[%s4432_s13 + $0x50] sm:$0xff] %vm485_vm0, %v2432_v36  ;;  %v2433_v38 = vadd.f32 %v2417_v51, %v2385_v63  ;;  %v2414_v40 = vmul.f32 %v2398_v57, %v2145_v8 }
 0x443   : > { %v3115_v18 = vpop.eup %3114  ;;  %v2399_v12 = vsub.f32 1.0, %v3113_v61  ;;  %3120 = vrcp.f32 %v2339_v41  ;;  %v2383_v58 = vmul.f32 %v4344_v43, %v3113_v61  ;;  %v4637_v43 = vmax.f32 %v4364_v54, 0.0 }
 0x444   : > { %2449 = vst.msk [vmem:[%s4432_s13 + $0x58] sm:$0xff] %vm485_vm0, %v2433_v38  ;;  %v2430_v19 = vadd.f32 %v2414_v40, %v2382_v52  ;;  %v2340_v15 = vadd.f32 1.0, %v3115_v18  ;;  %v3117_v59 = vpop.eup %3116 }
 0x445   : > { %v2415_v60 = vmul.f32 %v2399_v12, %v2146_v25  ;;  %v2341_v11 = vadd.f32 1.0, %v3117_v59 }
 0x446   : > { %2446 = vst.msk [vmem:[%s4432_s13 + $0x40] sm:$0xff] %vm485_vm0, %v2430_v19  ;;  %3122 = vrcp.f32 %v2340_v15 }
 0x447   : > { %v2431_v6 = vadd.f32 %v2415_v60, %v2383_v58  ;;  %3124 = vrcp.f32 %v2341_v11 }
 0x449   : > { %2447 = vst.msk [vmem:[%s4432_s13 + $0x48] sm:$0xff] %vm485_vm0, %v2431_v6 }
 0x44b   : > { %v3119_v8 = vpop.eup %3118 }
 0x44c   : > { %v2402_v46 = vsub.f32 1.0, %v3119_v8  ;;  %v2386_v55 = vmul.f32 %v4369_v28, %v3119_v8 }
 0x44d   : > { %v3121_v29 = vpop.eup %3120 }
 0x44e   : > { %v2418_v37 = vmul.f32 %v2402_v46, %v4637_v43  ;;  %v2403_v25 = vsub.f32 1.0, %v3121_v29  ;;  %v2387_v22 = vmul.f32 %v4388_v16, %v3121_v29 }
 0x450   : > { %v3123_v33 = vpop.eup %3122  ;;  %v2434_v7 = vadd.f32 %v2418_v37, %v2386_v55  ;;  %v2419_v62 = vmul.f32 %v2403_v25, %v4638_v39 }
 0x451   : > { %v2404_v48 = vsub.f32 1.0, %v3123_v33  ;;  %v3125_v20 = vpop.eup %3124  ;;  %v2388_v54 = vmul.f32 %v4376_v10, %v3123_v33 }
 0x452   : > { %2450 = vst.msk [vmem:[%s4432_s13 + $0x60] sm:$0xff] %vm485_vm0, %v2434_v7  ;;  %v2435_v28 = vadd.f32 %v2419_v62, %v2387_v22  ;;  %v2405_v47 = vsub.f32 1.0, %v3125_v20  ;;  %v2389_v16 = vmul.f32 %v4399_v34, %v3125_v20 }
 0x453   : > { %v2420_v24 = vmul.f32 %v2404_v48, %v4639_v26 }
 0x454   : > { %2451 = vst.msk [vmem:[%s4432_s13 + $0x68] sm:$0xff] %vm485_vm0, %v2435_v28  ;;  %v2421_v17 = vmul.f32 %v2405_v47, %v4640_v23 }
 0x455   : > { %v2436_v44 = vadd.f32 %v2420_v24, %v2388_v54 }
 0x456   : > { %v2437_v3 = vadd.f32 %v2421_v17, %v2389_v16 }
 0x457   : > { %2452 = vst.msk [vmem:[%s4432_s13 + $0x70] sm:$0xff] %vm485_vm0, %v2436_v44 }
 0x458   : > { %2453 = vst.msk [vmem:[%s4432_s13 + $0x78] sm:$0xff] %vm485_vm0, %v2437_v3 }
 0x459   : > { %3243 = shalt.err (!%p3240_p6)
}
 0x45a   : > { %s3244_s26 = scalar_lea.hbm %s4510_s21, 2048  ;;  %s3248_s23 = scalar_lea.hbm %s4569_s9, 4096 }
 0x45b   : > { %p3245_p8 = scmp.ne.s32.totalorder %s4510_s21, %s3244_s26  ;;  %p3249_p4 = scmp.lt.u32.totalorder %s4510_s21, %s4569_s9 }
 0x45c   : > { %p3250_p11 = scmp.lt.u32.totalorder %s3248_s23, %s3244_s26  ;;  %p3252_p3 = scmp.lt.u32.totalorder %s3244_s26, %s4510_s21 }
 0x45d   : > { %p3246_p10 = pnand %p3245_p8, %p3466_p12 }
 0x45e   : > { %p3251_p13 = por %p3250_p11, %p3249_p4 }
 0x45f   : > { %p3247_p0 = pneg %p3246_p10 }
 0x460   : > { %p3253_p7 = por %p3252_p3, %p3251_p13 }
 0x462   : > { %p3254_p9 = pnand %p3253_p7, %p3247_p0 }
 0x464   : > { %3257 = shalt.err (!%p3254_p9)
}
 0x465   : > { %s3317_s0 = smov 128   ;;  %s3318_s27 = smov 8  }
 0x466   : > { %2947 = dma.vmem_to_hbm [thread:$0]  (%p3466_p12), %s4512_s18, 2048, %s4510_s21, %s2455_s8, %s3317_s0, %s3317_s0, %s3318_s27  }
 0x467 PF: > { %s4641_s13 = sld [smem:[#allocation15_spill]]  ;;  %s2484_s19 = sand.u32 1, %s3292_s11  }
 0x468   : > { %p4643_p5 = scmp.ge.s32.totalorder %s3304_s14, 2  ;;  %s2485_s22 = scalar_lea.sflag [#allocation5], %s2484_s19 }
 0x46d   : > { %p4642_p1 = scmp.ne.s32.totalorder %s4641_s13, 0 }
 0x46f   : > { %p2961_p2 = pnand %p4643_p5, %p4642_p1 }
 0x471   : > { %3287 = dma.done.wait (!%p2961_p2), %s2485_s22, 2048  }
 0x472   : > { %3289 = vsyncadd (!%p2961_p2), %s2485_s22, 4294965248  ;;  %s4644_s14 = sld [smem:[#allocation16_spill]]  ;;  %s4645_s20 = sld [smem:[#allocation14_spill]] }
 0x473   : > { %s4646_s13 = sld [smem:[#allocation17_spill]]  ;;  %s4647_s11 = smov %s3296_s12 }
 0x478   : > { %p27_p6 = scmp.ge.s32.totalorder %s4644_s14, 4   ;;  %s4648_s12 = smov %s4645_s20 }
 0x47a   :  { %29 = sbr.rel (!%p27_p6) target bundleno = 10 (0xa), region = 118 }
 0x481   :  { %2490 = vsyncpa [#allocation4], 1 }
 0x482   :  { %2492 = vsyncpa [#allocation4 + $0x1], 1 }
 0x483   :  { %2493 = vsyncpa [#allocation7], 1 }
 0x484   :  { %2495 = vsyncpa [#allocation7 + $0x1], 1 }
 0x485   :  { %2496 = vsyncpa [#allocation5], 1 }
 0x486   :  { %2498 = vsyncpa [#allocation5 + $0x1], 1 }

</bundles_post_ra>
